<compile_context>
chip_gen: v7x
topology: tpu7x:2x2x1
jax: 0.10.0
libtpu: 0.0.40
codegen_flags: <defaults>
</compile_context>

<pallas_src>
import functools

import jax
import jax.numpy as jnp
from jax import lax
from jax.experimental import pallas as pl
from jax.experimental.pallas import tpu as pltpu


def _round_up(a, b):
    return ((a + b - 1) // b) * b


def _pick_exp_dtype():
    """bf16 exp on v6e/v7x (EUP-bound there, bf16 EUP supported); f32 otherwise."""
    try:
        kind = jax.devices()[0].device_kind.lower()
    except Exception:  # pragma: no cover - be conservative
        return jnp.float32
    if "v6" in kind or "v7" in kind:
        return jnp.bfloat16
    return jnp.float32


# ---------------------------------------------------------------------------
# Stage 1: fused K|V projection over flattened (B*S_pad, H) rows.
#   [k | v] = x @ [Wk | Wv] + [bk | bv]        (one MXU stream, N = 2D)
# ---------------------------------------------------------------------------
def _kv_proj_kernel(x_ref, w_ref, b_ref, k_ref, v_ref, *, D, compute_dtype):
    x = x_ref[...].astype(compute_dtype)          # (tm, H)  bf16 operands
    w = w_ref[...].astype(compute_dtype)          # (H, 2D)
    kv = jnp.dot(x, w, preferred_element_type=jnp.float32)
    kv = kv + b_ref[...].astype(jnp.float32)      # (tm, 2D) f32
    # Lane-aligned slices (D is a multiple of 128 in the demo).
    k_ref[...] = kv[:, :D].astype(k_ref.dtype)
    v_ref[...] = kv[:, D:].astype(v_ref.dtype)


# ---------------------------------------------------------------------------
# Stage 2: flash attention with online softmax.
# grid = (B, num_q_tiles, num_kv_tiles); kv axis last ("arbitrary" reduction).
# q is projected in-kernel once per (b, q-tile) -- no Q HBM round trip.
# ---------------------------------------------------------------------------
def _flash_attn_kernel(x_ref, wq_ref, bq_ref, k_ref, v_ref, o_ref,
                       q_scr, m_scr, l_scr, acc_scr,
                       *, scale, kv_len, tkv, needs_mask, compute_dtype,
                       exp_dtype):
    ki = pl.program_id(2)

    @pl.when(ki == 0)
    def _():
        # Project q for this (b, q-tile) once; 1/sqrt(D) folded in here.
        xq = x_ref[0].astype(compute_dtype)                       # (tq, H)
        wq = wq_ref[...].astype(compute_dtype)                    # (H, D)
        q = jnp.dot(xq, wq, preferred_element_type=jnp.float32)
        q = (q + bq_ref[...].astype(jnp.float32)) * scale
        q_scr[...] = q.astype(q_scr.dtype)
        m_scr[...] = jnp.full(m_scr.shape, -jnp.inf, dtype=m_scr.dtype)
        l_scr[...] = jnp.zeros(l_scr.shape, dtype=l_scr.dtype)
        acc_scr[...] = jnp.zeros(acc_scr.shape, dtype=acc_scr.dtype)

    q = q_scr[...]                                                # (tq, D) bf16
    k = k_ref[0]                                                  # (tkv, D) bf16
    v = v_ref[0]                                                  # (tkv, D) bf16

    # scores: contract last dims directly -- no k.T materialization.
    s = lax.dot_general(q, k, (((1,), (1,)), ((), ())),
                        preferred_element_type=jnp.float32)       # (tq, tkv) f32

    if needs_mask:  # static: only traced when the sequence was padded
        kv_pos = ki * tkv + lax.broadcasted_iota(jnp.int32, s.shape, 1)
        s = jnp.where(kv_pos < kv_len, s, jnp.float32(-1e30))

    m_prev = m_scr[...]                                           # (tq, 1)
    m_new = jnp.maximum(m_prev, jnp.max(s, axis=-1, keepdims=True))
    alpha = jnp.exp(m_prev - m_new)                               # (tq, 1) f32
    p = jnp.exp((s - m_new).astype(exp_dtype))                    # bf16 on v6e/v7x

    l_scr[...] = alpha * l_scr[...] + jnp.sum(
        p.astype(jnp.float32), axis=-1, keepdims=True)
    acc_scr[...] = alpha * acc_scr[...] + jnp.dot(
        p.astype(v.dtype), v, preferred_element_type=jnp.float32)
    m_scr[...] = m_new

    @pl.when(ki == pl.num_programs(2) - 1)
    def _():
        inv_l = pl.reciprocal(l_scr[...], approx=True)            # EUP vrcp
        o_ref[0] = (acc_scr[...] * inv_l).astype(o_ref.dtype)


def attn_forward(x, wk, wq, wv, bk, bq, bv):
    """x: (B, S, H); w*: (H, D); b*: (D,). Returns (B, S, D) in x.dtype."""
    B, S, H = x.shape
    D = wk.shape[1]
    scale = 1.0 / (D ** 0.5)
    out_dtype = x.dtype

    compute_dtype = jnp.bfloat16     # MXU operands (f32 acc)
    interm_dtype = jnp.bfloat16      # stage-1 -> stage-2 HBM handoff
    exp_dtype = _pick_exp_dtype()

    # ---- sequence padding & tile selection ---------------------------------
    if S <= 128:
        S_pad = max(_round_up(S, 16), 16)      # single tile, packed-sublane mult
        tq = tkv = S_pad
    else:
        S_pad = _round_up(S, 128)
        tq = 256 if S_pad % 256 == 0 else 128
        tkv = next(c for c in (1024, 512, 256, 128) if S_pad % c == 0)
    # Padding (< 128 <= tkv) guarantees no kv tile is all-padding.
    needs_mask = S_pad != S
    x_p = jnp.pad(x, ((0, 0), (0, S_pad - S), (0, 0))) if needs_mask else x

    # ---- Stage 1: fused K|V projection over flattened rows -----------------
    M = B * S_pad
    x2d = x_p.reshape(M, H)
    wkv = jnp.concatenate([wk, wv], axis=1)                     # (H, 2D)
    bkv = jnp.concatenate([bk, bv], axis=0).reshape(1, 2 * D)   # (1, 2D)

    tm = next((c for c in (1024, 512, 256, 128, 64, 32, 16, 8) if M % c == 0), M)

    k2d, v2d = pl.pallas_call(
        functools.partial(_kv_proj_kernel, D=D, compute_dtype=compute_dtype),
        out_shape=(jax.ShapeDtypeStruct((M, D), interm_dtype),) * 2,
        grid_spec=pltpu.PrefetchScalarGridSpec(
            num_scalar_prefetch=0,
            grid=(M // tm,),
            in_specs=[pl.BlockSpec((tm, H), lambda i: (i, 0)),
                      pl.BlockSpec((H, 2 * D), lambda i: (0, 0)),
                      pl.BlockSpec((1, 2 * D), lambda i: (0, 0))],
            out_specs=(pl.BlockSpec((tm, D), lambda i: (i, 0)),
                       pl.BlockSpec((tm, D), lambda i: (i, 0))),
        ),
        compiler_params=pltpu.CompilerParams(
            dimension_semantics=("parallel",)),
    )(x2d, wkv, bkv)

    k3 = k2d.reshape(B, S_pad, D)
    v3 = v2d.reshape(B, S_pad, D)

    # ---- Stage 2: flash attention (q projected in-kernel) ------------------
    nq, nk = S_pad // tq, S_pad // tkv
    bq2 = bq.reshape(1, D)

    x_spec = pl.BlockSpec((1, tq, H), lambda b, qi, ki: (b, qi, 0))
    wq_spec = pl.BlockSpec((H, D), lambda b, qi, ki: (0, 0))
    bq_spec = pl.BlockSpec((1, D), lambda b, qi, ki: (0, 0))
    kv_spec = pl.BlockSpec((1, tkv, D), lambda b, qi, ki: (b, ki, 0))
    o_spec = pl.BlockSpec((1, tq, D), lambda b, qi, ki: (b, qi, 0))

    out = pl.pallas_call(
        functools.partial(_flash_attn_kernel, scale=scale, kv_len=S, tkv=tkv,
                          needs_mask=needs_mask, compute_dtype=compute_dtype,
                          exp_dtype=exp_dtype),
        out_shape=jax.ShapeDtypeStruct((B, S_pad, D), out_dtype),
        grid_spec=pltpu.PrefetchScalarGridSpec(
            num_scalar_prefetch=0,
            grid=(B, nq, nk),
            in_specs=[x_spec, wq_spec, bq_spec, kv_spec, kv_spec],
            out_specs=o_spec,
            scratch_shapes=[
                pltpu.VMEM((tq, D), compute_dtype),   # projected q tile
                pltpu.VMEM((tq, 1), jnp.float32),     # running max
                pltpu.VMEM((tq, 1), jnp.float32),     # running sum
                pltpu.VMEM((tq, D), jnp.float32),     # output accumulator
            ],
        ),
        compiler_params=pltpu.CompilerParams(
            dimension_semantics=("parallel", "parallel", "arbitrary")),
    )(x_p, wq, bq2, k3, v3)

    return out[:, :S, :] if needs_mask else out


def attn_reference(x, wk, wq, wv, bk, bq, bv):
    """Pure-JAX reference mirroring the PyTorch forward (high precision)."""
    D = wk.shape[1]
    hp = lax.Precision.HIGHEST
    k = jnp.einsum("bsh,hd->bsd", x, wk, precision=hp) + bk
    q = jnp.einsum("bsh,hd->bsd", x, wq, precision=hp) + bq
    v = jnp.einsum("bsh,hd->bsd", x, wv, precision=hp) + bv
    s = jnp.einsum("bsd,btd->bst", q, k, precision=hp) / (D ** 0.5)
    w = jax.nn.softmax(s, axis=-1)
    return jnp.einsum("bst,btd->bsd", w, v, precision=hp)


if __name__ == "__main__":
    # Shapes chosen so every code path is exercised: S=1000 -> S_pad=1024,
    # tq=256 (4 q-tiles), tkv=512 (2 kv steps -> real online softmax), plus the
    # padding mask and the final un-pad slice. D=128 keeps outputs lane-dense.
    batch, seq_len, hidden_dim, kqv_dim = 2, 1000, 128, 128

    key = jax.random.PRNGKey(0)
    kx, kwk, kwq, kwv, kbk, kbq, kbv = jax.random.split(key, 7)

    x = jax.random.normal(kx, (batch, seq_len, hidden_dim), dtype=jnp.float32)
    bound = 1.0 / (hidden_dim ** 0.5)
    wk = jax.random.uniform(kwk, (hidden_dim, kqv_dim), jnp.float32, -bound, bound)
    wq = jax.random.uniform(kwq, (hidden_dim, kqv_dim), jnp.float32, -bound, bound)
    wv = jax.random.uniform(kwv, (hidden_dim, kqv_dim), jnp.float32, -bound, bound)
    bk = jax.random.uniform(kbk, (kqv_dim,), jnp.float32, -bound, bound)
    bq = jax.random.uniform(kbq, (kqv_dim,), jnp.float32, -bound, bound)
    bv = jax.random.uniform(kbv, (kqv_dim,), jnp.float32, -bound, bound)

    out = jax.block_until_ready(attn_forward(x, wk, wq, wv, bk, bq, bv))
    ref = attn_reference(x, wk, wq, wv, bk, bq, bv)

    assert out.shape == (batch, seq_len, kqv_dim)
    assert jnp.allclose(out, ref, atol=1e-2, rtol=1e-2), (
        "mismatch vs reference, max abs err = "
        f"{float(jnp.max(jnp.abs(out - ref)))}")

    print("KERNEL_OK")
</pallas_src>

<mosaic_0001>
module attributes {stable_mosaic.version = 11 : i64} {
  func.func @_kv_proj_kernel(%arg0: i32, %arg1: memref<1024x128xf32, #tpu.memory_space<vmem>>, %arg2: memref<128x256xf32, #tpu.memory_space<vmem>>, %arg3: memref<1x256xf32, #tpu.memory_space<vmem>>, %arg4: memref<1024x128xbf16, #tpu.memory_space<vmem>>, %arg5: memref<1024x128xbf16, #tpu.memory_space<vmem>>) attributes {dimension_semantics = [#tpu.dimension_semantics<parallel>], iteration_bounds = array<i64: 2>, scalar_prefetch = 0 : i64, scratch_operands = 0 : i64, tpu.core_type = #tpu.core_type<tc>, window_params = [{transform_indices = @transform_0, window_bounds = array<i64: 1024, 128>}, {pipeline_mode = #tpu.pipeline_mode<synchronous>, transform_indices = @transform_1, window_bounds = array<i64: 128, 256>}, {pipeline_mode = #tpu.pipeline_mode<synchronous>, transform_indices = @transform_2, window_bounds = array<i64: 1, 256>}, {transform_indices = @transform_3, window_bounds = array<i64: 1024, 128>}, {transform_indices = @transform_4, window_bounds = array<i64: 1024, 128>}]} {
    %c0 = arith.constant 0 : index
    %c0_0 = arith.constant 0 : index
    %0 = vector.load %arg1[%c0, %c0_0] : memref<1024x128xf32, #tpu.memory_space<vmem>>, vector<1024x128xf32>
    %1 = arith.truncf %0 : vector<1024x128xf32> to vector<1024x128xbf16>
    %c0_1 = arith.constant 0 : index
    %c0_2 = arith.constant 0 : index
    %2 = vector.load %arg2[%c0_1, %c0_2] : memref<128x256xf32, #tpu.memory_space<vmem>>, vector<128x256xf32>
    %3 = arith.truncf %2 : vector<128x256xf32> to vector<128x256xbf16>
    %cst = arith.constant dense<0.000000e+00> : vector<1024x256xf32>
    %4 = tpu.matmul %1, %3, %cst {dimension_numbers = #tpu.dot_dimension_numbers<[1], [0], [0], [1], [0, 0, 1, 1], [], []>} : vector<1024x128xbf16>, vector<128x256xbf16>, vector<1024x256xf32> -> vector<1024x256xf32>
    %c0_3 = arith.constant 0 : index
    %c0_4 = arith.constant 0 : index
    %5 = vector.load %arg3[%c0_3, %c0_4] : memref<1x256xf32, #tpu.memory_space<vmem>>, vector<1x256xf32>
    %6 = vector.broadcast %5 : vector<1x256xf32> to vector<1024x256xf32>
    %7 = arith.addf %4, %6 : vector<1024x256xf32>
    %8 = vector.extract_strided_slice %7 {offsets = [0, 0], sizes = [1024, 128], strides = [1, 1]} : vector<1024x256xf32> to vector<1024x128xf32>
    %9 = arith.truncf %8 : vector<1024x128xf32> to vector<1024x128xbf16>
    %c0_5 = arith.constant 0 : index
    %c0_6 = arith.constant 0 : index
    %10 = vector.load %arg4[%c0_5, %c0_6] : memref<1024x128xbf16, #tpu.memory_space<vmem>>, vector<1024x128xbf16>
    tpu.vector_store %arg4[%c0_5, %c0_6], %9 {strides = array<i32>} : memref<1024x128xbf16, #tpu.memory_space<vmem>>, vector<1024x128xbf16>,
    %11 = vector.extract_strided_slice %7 {offsets = [0, 128], sizes = [1024, 128], strides = [1, 1]} : vector<1024x256xf32> to vector<1024x128xf32>
    %12 = arith.truncf %11 : vector<1024x128xf32> to vector<1024x128xbf16>
    %c0_7 = arith.constant 0 : index
    %c0_8 = arith.constant 0 : index
    %13 = vector.load %arg5[%c0_7, %c0_8] : memref<1024x128xbf16, #tpu.memory_space<vmem>>, vector<1024x128xbf16>
    tpu.vector_store %arg5[%c0_7, %c0_8], %12 {strides = array<i32>} : memref<1024x128xbf16, #tpu.memory_space<vmem>>, vector<1024x128xbf16>,
    return
  }
  func.func @transform_0(%arg0: i32) -> (i32, i32) {
    %c0_i32 = arith.constant 0 : i32
    %c0_i32_0 = arith.constant 0 : i32
    return %arg0, %c0_i32 : i32, i32
  }
  func.func @transform_1(%arg0: i32) -> (i32, i32) {
    %c0_i32 = arith.constant 0 : i32
    %c0_i32_0 = arith.constant 0 : i32
    %c0_i32_1 = arith.constant 0 : i32
    return %c0_i32, %c0_i32_0 : i32, i32
  }
  func.func @transform_2(%arg0: i32) -> (i32, i32) {
    %c0_i32 = arith.constant 0 : i32
    %c0_i32_0 = arith.constant 0 : i32
    %c0_i32_1 = arith.constant 0 : i32
    return %c0_i32, %c0_i32_0 : i32, i32
  }
  func.func @transform_3(%arg0: i32) -> (i32, i32) {
    %c0_i32 = arith.constant 0 : i32
    %c0_i32_0 = arith.constant 0 : i32
    return %arg0, %c0_i32 : i32, i32
  }
  func.func @transform_4(%arg0: i32) -> (i32, i32) {
    %c0_i32 = arith.constant 0 : i32
    %c0_i32_0 = arith.constant 0 : i32
    return %arg0, %c0_i32 : i32, i32
  }
}

</mosaic_0001>

<bundles_post_ra>
// kernel: tpu_custom_call.1
= control target key start
LH: loop header
LB: loop body
LE: loop exit
PB: predicated region body
PF: predicated region fallthrough
CT: control target
= control target key end

     0   :  { %10 = vsyncpa [#allocation3], 0  ;;  %s5019_s0 = inlined_call_operand.hbm [shape: f32[2048,128], index: 0, kind: input, shape index: {}]   ;;  %s5020_s1 = inlined_call_operand.hbm [shape: f32[128,256], index: 1, kind: input, shape index: {}]   ;;  %s5021_s2 = inlined_call_operand.vmem [shape: f32[1,256], index: 2, kind: input, shape index: {}]   ;;  %s5022_s3 = inlined_call_operand.hbm [shape: bf16[2048,128], index: 3, kind: output, shape index: {0}]   ;;  %s5023_s4 = inlined_call_operand.hbm [shape: bf16[2048,128], index: 4, kind: output, shape index: {1}]  }
   0x1   :  { %12 = vsyncpa [#allocation3 + $0x1], 0 }
   0x2   :  { %13 = vsyncpa [#allocation6], 0 }
   0x3   :  { %14 = vsyncpa [#allocation4], 0 }
   0x4   :  { %16 = vsyncpa [#allocation4 + $0x1], 0 }
   0x5   :  { %17 = vsyncpa [#allocation9], 0 }
   0x6   :  { %19 = vsyncpa [#allocation9 + $0x1], 0  ;;  %s4185_s15 = smov 0   ;;  %s4187_s16 = smov 0  }
   0x7   :  { %s4189_s17 = smov 0   ;;  %s4191_s18 = smov 0  }
   0x8 LB: > { %s4206_s19 = sadd.s32 4294967295, %s4147_s18   ;;  %s2601_s20 = sadd.s32 4294967294, %s4147_s18   ;;  %s4147_s18 = sphi %s4191_s18, %s5043_s18   ;;  %s4143_s17 = sphi %s4189_s17, %s5042_s17   ;;  %s4139_s16 = sphi %s4187_s16, %s5041_s16   ;;  %s4135_s15 = sphi %s4185_s15, %s5040_s15  }
   0x9   : > { %p45_p0 = scmp.ne.s32.totalorder %s4139_s16, %s4135_s15  ;;  %p5024_p1 = scmp.eq.s32.totalorder %s4206_s19, 0 }
   0xa   : > { %p117_p3 = scmp.eq.s32.totalorder %s2601_s20, 1  ;;  %p2602_p5 = scmp.ge.s32.totalorder %s4147_s18, 1 }
   0xb   : > { %p4215_p4 = por %p5024_p1, %p45_p0  ;;  %p150_p7 = scmp.lt.s32.totalorder %s4147_s18, 3 }
   0xc   : > { %p4220_p6 = por %p117_p3, %p45_p0  ;;  %s4149_s24 = smov [#allocation5]  }
   0xd   : > { %s5027_s21 = scalar_select %p4215_p4, 1, 0 }
   0xe   : > { %s5028_s22 = scalar_select %p4220_p6, 1, 0 }
   0xf   : > { %p4225_p8 = pnand %p2602_p5, %p150_p7  ;;  %s162_s25 = sshll.u32 %s4149_s24, 4  ;;  %s4229_s25 = int_to_ptr.vmem [resolvable:$true] %s162_s25 }
  0x10   : > { %s4241_s27 = sadd.s32 1, %s4147_s18   ;;  %s32_s28 = sadd.s32 1, %s4143_s17 }
  0x11   : > { %s5029_s23 = scalar_select %p4225_p8, 1, 0 }
  0x12   : > { %p3928_p9 = pneg %p4225_p8  ;;  %s29_s29 = ssub.s32 %s4147_s18, %s4241_s27 }
  0x13   : > { %s3987_s6 = scalar_lea.hbm %s5020_s1, 4096 }
  0x14   : > { %p4236_p11 = pnand %p3928_p9, %p5024_p1  ;;  %p3988_p12 = scmp.ne.s32.totalorder %s5020_s1, %s3987_s6 }
  0x15   : > { %p3994_p5 = scmp.lt.u32.totalorder %s3987_s6, %s5020_s1 }
  0x16   : > { %p3989_p13 = pneg %p4236_p11 }
  0x18   : > { %p3990_p0 = pnand %p3989_p13, %p3988_p12 }
  0x1a   : > { %p3991_p3 = pneg %p3990_p0 }
  0x1c   : > { %p3996_p7 = pnand %p3994_p5, %p3991_p3 }
  0x1e   : > { %3999 = shalt.err (!%p3996_p7)
}
  0x1f   : > { %s4000_s11 = scalar_lea.vmem %s4229_s25, 4096  ;;  %p4008_p2 = scmp.lt.s32.totalorder %s4229_s25, %s4229_s25 }
  0x20   : > { %p4001_p9 = scmp.ne.s32.totalorder %s4229_s25, %s4000_s11  ;;  %p4009_p6 = scmp.lt.s32.totalorder %s4000_s11, %s4000_s11 }
  0x22   : > { %p4003_p10 = pnand %p4001_p9, %p3989_p13  ;;  %p4010_p4 = por %p4009_p6, %p4008_p2 }
  0x24   : > { %p4004_p1 = pneg %p4003_p10 }
  0x26   : > { %p4011_p8 = pnand %p4010_p4, %p4004_p1 }
  0x28   : > { %4014 = shalt.err (!%p4011_p8)
}
  0x29   : > { %s4150_s12 = smov 256   ;;  %s4151_s13 = smov 16  }
  0x2a   : > { %3931 = dma.hbm_to_vmem [thread:$0]  (!%p4236_p11), %s5020_s1, 4096, %s4229_s25, [#allocation6], %s4150_s12, %s4150_s12, %s4151_s13  }
  0x2b   : > { %p30_p2 = scmp.eq.s32.totalorder %s29_s29, 0  ;;  %p39_p1 = scmp.ne.s32.totalorder %s4143_s17, %s4139_s16 }
  0x2c   : > { %p40_p4 = scmp.eq.s32.totalorder %s4147_s18, 0  ;;  %p3944_p6 = scmp.lt.s32.totalorder %s4147_s18, 2 }
  0x2d   : > { %s4272_s24 = scalar_select %p30_p2, %s4143_s17, %s32_s28  }
  0x2e   : > { %p41_p8 = por %p40_p4, %p39_p1  ;;  %p5031_p10 = scmp.eq.s32.totalorder %s4206_s19, 1 }
  0x2f   : > { %s179_s5 = sand.u32 1, %s4143_s17   ;;  %s2877_s6 = sshll.u32 %s4147_s18, 14 }
  0x30   : > { %p4276_p12 = por %p5031_p10, %p39_p1  ;;  %s2605_s7 = sshll.u32 %s179_s5, 10 }
  0x31   : > { %s4285_s9 = scalar_lea.hbm %s5019_s0, %s2877_s6  ;;  %s183_s25 = scalar_lea.vmem [#allocation2], %s2605_s7 }
  0x32   : > { %s190_s28 = sshll.u32 %s183_s25, 4  ;;  %p4287_p11 = pnand %p3944_p6, %p41_p8  ;;  %s4291_s28 = int_to_ptr.vmem [resolvable:$true] %s190_s28 }
  0x33   : > { %s4293_s10 = scalar_lea.sflag [#allocation3], %s179_s5  ;;  %s4015_s11 = scalar_lea.hbm %s4285_s9, 16384 }
  0x34   : > { %p4016_p13 = scmp.ne.s32.totalorder %s4285_s9, %s4015_s11  ;;  %p4017_p0 = pneg %p4287_p11 }
  0x35   : > { %s4020_s14 = scalar_lea.hbm %s5019_s0, 32768  ;;  %p4021_p7 = scmp.lt.u32.totalorder %s4285_s9, %s5019_s0 }
  0x36   : > { %p4018_p3 = pnand %p4017_p0, %p4016_p13  ;;  %p4022_p9 = scmp.lt.u32.totalorder %s4020_s14, %s4015_s11 }
  0x37   : > { %p4024_p1 = scmp.lt.u32.totalorder %s4015_s11, %s4285_s9 }
  0x38   : > { %p4019_p5 = pneg %p4018_p3  ;;  %p4023_p2 = por %p4022_p9, %p4021_p7 }
  0x3a   : > { %p4025_p4 = por %p4024_p1, %p4023_p2 }
  0x3c   : > { %p4026_p6 = pnand %p4025_p4, %p4019_p5 }
  0x3e   : > { %4029 = shalt.err (!%p4026_p6)
}
  0x3f   : > { %s4030_s5 = scalar_lea.vmem %s4291_s28, 16384  ;;  %s4152_s7 = smov [#allocation2]  }
  0x40   : > { %p4031_p8 = scmp.ne.s32.totalorder %s4291_s28, %s4030_s5  ;;  %s4035_s26 = sshll.u32 %s4152_s7, 4  ;;  %s4036_s26 = int_to_ptr.vmem [resolvable:$false] %s4035_s26 }
  0x41   : > { %s4037_s8 = scalar_lea.vmem %s4036_s26, 32768  ;;  %p4038_p3 = scmp.lt.s32.totalorder %s4291_s28, %s4036_s26 }
  0x42   : > { %p4033_p10 = pnand %p4031_p8, %p4017_p0  ;;  %p4039_p7 = scmp.lt.s32.totalorder %s4037_s8, %s4030_s5 }
  0x44   : > { %p4034_p13 = pneg %p4033_p10  ;;  %p4040_p9 = por %p4039_p7, %p4038_p3 }
  0x46   : > { %p4041_p2 = pnand %p4040_p9, %p4034_p13 }
  0x48   : > { %4044 = shalt.err (!%p4041_p2)
}
  0x49   : > { %s4153_s25 = smov 128   ;;  %s4154_s11 = smov 8  }
  0x4a   : > { %3935 = dma.hbm_to_vmem [thread:$0]  (!%p4287_p11), %s4285_s9, 16384, %s4291_s28, %s4293_s10, %s4153_s25, %s4153_s25, %s4154_s11  }
  0x4b   : > { %p5034_p0 = scmp.ne.s32.totalorder %s5029_s23, 0 }
  0x4c   : > { %s4324_s12 = sand.u32 (!%p5034_p0), 1, %s4139_s16   ;;  %p5035_p5 = scmp.ne.s32.totalorder (!%p5034_p0), %s5027_s21, 0 }
  0x4d   : > { %202 = sbr.rel (%p5034_p0) target bundleno = 628 (0x274), region = 32  ;;  %s2609_s13 = sshll.u32 (!%p5034_p0), %s4324_s12, 10 }
  0x4e   : > { %s205_s14 = scalar_lea.sflag (!%p5034_p0), [#allocation3], %s4324_s12  ;;  %s4328_s20 = scalar_lea.vmem (!%p5034_p0), [#allocation2], %s2609_s13 }
  0x54   : > { %4118 = dma.done.wait (%p5035_p5), %s205_s14, 16384  }
  0x55   : > { %4120 = vsyncadd (%p5035_p5), %s205_s14, 4294950912  ;;  %p5036_p11 = scmp.eq.s32.totalorder %s4206_s19, 0 }
  0x57   : > { %4122 = dma.done.wait (%p5036_p11), [#allocation6], 4096   ;;  %p5037_p1 = pmov %p5036_p11 }
  0x58   : > { %v4155_v0 = vmov 0   ;;  %v439_v1 = vld [vmem:[#allocation5 + $0x8] sm:$0xff]  ;;  %v441_v2 = vld [vmem:[#allocation5 + $0x18] sm:$0xff]  ;;  %v438_v3 = vld [vmem:[#allocation5] sm:$0xff]  ;;  %s2611_s9 = sshll.u32 %s4324_s12, 9  ;;  %s3134_s10 = sshll.u32 %s4206_s19, 13 }
  0x59   : > { %4124 = vsyncadd (%p5037_p1), [#allocation6], 4294963200  ;;  %530 = vmatprep.mubr.bf16.mxu0 %v4155_v0  ;;  %850 = vmatprep.mubr.bf16.mxu1 %v4155_v0  ;;  %v471_v4 = vpack.c.bf16 %v441_v2, %v439_v1  ;;  %v440_v5 = vld [vmem:[#allocation5 + $0x10] sm:$0xff]  ;;  %v443_v6 = vld [vmem:[#allocation5 + $0x28] sm:$0xff]  ;;  %s4530_s28 = scalar_lea.vmem [#allocation7], %s2611_s9  ;;  %s4536_s29 = scalar_lea.vmem [#allocation8], %s2611_s9 }
  0x5a   : > { %v445_v7 = vld [vmem:[#allocation5 + $0x38] sm:$0xff]  ;;  %v470_v8 = vpack.c.bf16 %v440_v5, %v438_v3  ;;  %v442_v10 = vld [vmem:[#allocation5 + $0x20] sm:$0xff]  ;;  %v444_v11 = vld [vmem:[#allocation5 + $0x30] sm:$0xff]  ;;  %s2470_s6 = sshll.u32 %s4530_s28, 4  ;;  %s4927_s19 = scalar_lea.hbm %s5022_s3, %s3134_s10  ;;  %s4934_s6 = int_to_ptr.vmem [resolvable:$true] %s2470_s6 }
  0x5b   : > { %v473_v9 = vpack.c.bf16 %v445_v7, %v443_v6  ;;  %v447_v12 = vld [vmem:[#allocation5 + $0x48] sm:$0xff]  ;;  %498 = vmatprep.subr.bf16.mxu0 %v471_v4  ;;  %3902 = vmatprep.subr.bf16.mxu1 %v471_v4  ;;  %v449_v13 = vld [vmem:[#allocation5 + $0x58] sm:$0xff]  ;;  %v472_v14 = vpack.c.bf16 %v444_v11, %v442_v10  ;;  %v446_v16 = vld [vmem:[#allocation5 + $0x40] sm:$0xff]  ;;  %s2486_s26 = sshll.u32 %s4536_s29, 4  ;;  %s4939_s11 = scalar_lea.hbm %s5023_s4, %s3134_s10  ;;  %s4941_s26 = int_to_ptr.vmem [resolvable:$true] %s2486_s26 }
  0x5c   : > { %499 = vmatpush1.bf16.msra.mxu0 %v470_v8  ;;  %3910 = vmatpush1.bf16.msra.mxu1 %v470_v8  ;;  %v475_v15 = vpack.c.bf16 %v449_v13, %v447_v12  ;;  %v448_v17 = vld [vmem:[#allocation5 + $0x50] sm:$0xff]  ;;  %v451_v18 = vld [vmem:[#allocation5 + $0x68] sm:$0xff]  ;;  %v453_v19 = vld [vmem:[#allocation5 + $0x78] sm:$0xff]  ;;  %s2452_s13 = scalar_lea.sflag [#allocation4], %s4324_s12  ;;  %s4045_s14 = scalar_lea.vmem %s4934_s6, 8192 }
  0x5d   : > { %500 = vmatprep.subr.bf16.mxu0 %v473_v9  ;;  %3903 = vmatprep.subr.bf16.mxu1 %v473_v9  ;;  %v474_v20 = vpack.c.bf16 %v448_v17, %v446_v16  ;;  %v477_v21 = vpack.c.bf16 %v453_v19, %v451_v18  ;;  %v450_v22 = vld [vmem:[#allocation5 + $0x60] sm:$0xff]  ;;  %v452_v23 = vld [vmem:[#allocation5 + $0x70] sm:$0xff]  ;;  %v455_v24 = vld [vmem:[#allocation5 + $0x88] sm:$0xff]  ;;  %p4046_p4 = scmp.ne.s32.totalorder %s4934_s6, %s4045_s14 }
  0x5e   : > { %v457_v25 = vld [vmem:[#allocation5 + $0x98] sm:$0xff]  ;;  %v476_v26 = vpack.c.bf16 %v452_v23, %v450_v22  ;;  %v454_v28 = vld [vmem:[#allocation5 + $0x80] sm:$0xff]  ;;  %v456_v29 = vld [vmem:[#allocation5 + $0x90] sm:$0xff] }
  0x5f   : > { %v479_v27 = vpack.c.bf16 %v457_v25, %v455_v24  ;;  %v459_v30 = vld [vmem:[#allocation5 + $0xa8] sm:$0xff]  ;;  %v461_v31 = vld [vmem:[#allocation5 + $0xb8] sm:$0xff]  ;;  %v478_v32 = vpack.c.bf16 %v456_v29, %v454_v28  ;;  %v458_v34 = vld [vmem:[#allocation5 + $0xa0] sm:$0xff]  ;;  %p4047_p6 = pnand %p4046_p4, %p4276_p12 }
  0x60   : > { %501 = vmatpush1.bf16.msra.mxu0 %v472_v14  ;;  %3911 = vmatpush1.bf16.msra.mxu1 %v472_v14  ;;  %v481_v33 = vpack.c.bf16 %v461_v31, %v459_v30  ;;  %v460_v35 = vld [vmem:[#allocation5 + $0xb0] sm:$0xff]  ;;  %v463_v36 = vld [vmem:[#allocation5 + $0xc8] sm:$0xff]  ;;  %v465_v37 = vld [vmem:[#allocation5 + $0xd8] sm:$0xff] }
  0x61   : > { %502 = vmatprep.subr.bf16.mxu0 %v475_v15  ;;  %3904 = vmatprep.subr.bf16.mxu1 %v475_v15  ;;  %v480_v38 = vpack.c.bf16 %v460_v35, %v458_v34  ;;  %v483_v39 = vpack.c.bf16 %v465_v37, %v463_v36  ;;  %v462_v40 = vld [vmem:[#allocation5 + $0xc0] sm:$0xff]  ;;  %v464_v41 = vld [vmem:[#allocation5 + $0xd0] sm:$0xff]  ;;  %v467_v42 = vld [vmem:[#allocation5 + $0xe8] sm:$0xff]  ;;  %p4048_p8 = pneg %p4047_p6 }
  0x62   : > { %v469_v43 = vld [vmem:[#allocation5 + $0xf8] sm:$0xff]  ;;  %v482_v44 = vpack.c.bf16 %v464_v41, %v462_v40  ;;  %v466_v46 = vld [vmem:[#allocation5 + $0xe0] sm:$0xff]  ;;  %v468_v47 = vld [vmem:[#allocation5 + $0xf0] sm:$0xff] }
  0x63   : > { %v485_v45 = vpack.c.bf16 %v469_v43, %v467_v42  ;;  %v246_v48 = vld [vmem:[%s4328_s20] sm:$0xff]  ;;  %v484_v49 = vpack.c.bf16 %v468_v47, %v466_v46  ;;  %v247_v50 = vld [vmem:[%s4328_s20 + $0x8] sm:$0xff]  ;;  %v248_v55 = vld [vmem:[%s4328_s20 + $0x10] sm:$0xff] }
  0x64   : > { %503 = vmatpush1.bf16.msra.mxu0 %v474_v20  ;;  %3912 = vmatpush1.bf16.msra.mxu1 %v474_v20  ;;  %v310_v51 = vld [vmem:[%s4328_s20 + $0x200] sm:$0xff]  ;;  %v311_v52 = vld [vmem:[%s4328_s20 + $0x208] sm:$0xff]  ;;  %v374_v53 = vpack.c.bf16 %v247_v50, %v246_v48  ;;  %v249_v56 = vld [vmem:[%s4328_s20 + $0x18] sm:$0xff] }
  0x65   : > { %504 = vmatprep.subr.bf16.mxu0 %v477_v21  ;;  %3905 = vmatprep.subr.bf16.mxu1 %v477_v21  ;;  %v406_v54 = vpack.c.bf16 %v311_v52, %v310_v51  ;;  %v312_v57 = vld [vmem:[%s4328_s20 + $0x210] sm:$0xff]  ;;  %v313_v58 = vld [vmem:[%s4328_s20 + $0x218] sm:$0xff]  ;;  %v375_v59 = vpack.c.bf16 %v249_v56, %v248_v55  ;;  %v250_v61 = vld [vmem:[%s4328_s20 + $0x20] sm:$0xff] }
  0x66   : > { %v407_v60 = vpack.c.bf16 %v313_v58, %v312_v57  ;;  %v251_v62 = vld [vmem:[%s4328_s20 + $0x28] sm:$0xff]  ;;  %v314_v63 = vld [vmem:[%s4328_s20 + $0x220] sm:$0xff]  ;;  %v252_v4 = vld [vmem:[%s4328_s20 + $0x30] sm:$0xff] }
  0x67   : > { %v315_v1 = vld [vmem:[%s4328_s20 + $0x228] sm:$0xff]  ;;  %v376_v2 = vpack.c.bf16 %v251_v62, %v250_v61  ;;  %v253_v5 = vld [vmem:[%s4328_s20 + $0x38] sm:$0xff]  ;;  %v316_v6 = vld [vmem:[%s4328_s20 + $0x230] sm:$0xff] }
  0x68   : > { %505 = vmatpush1.bf16.msra.mxu0 %v476_v26  ;;  %3913 = vmatpush1.bf16.msra.mxu1 %v476_v26  ;;  %v408_v3 = vpack.c.bf16 %v315_v1, %v314_v63  ;;  %v317_v7 = vld [vmem:[%s4328_s20 + $0x238] sm:$0xff]  ;;  %v377_v8 = vpack.c.bf16 %v253_v5, %v252_v4  ;;  %v254_v10 = vld [vmem:[%s4328_s20 + $0x40] sm:$0xff]  ;;  %v255_v11 = vld [vmem:[%s4328_s20 + $0x48] sm:$0xff] }
  0x69   : > { %506 = vmatprep.subr.bf16.mxu0 %v479_v27  ;;  %3906 = vmatprep.subr.bf16.mxu1 %v479_v27  ;;  %v409_v9 = vpack.c.bf16 %v317_v7, %v316_v6  ;;  %v318_v12 = vld [vmem:[%s4328_s20 + $0x240] sm:$0xff]  ;;  %v319_v13 = vld [vmem:[%s4328_s20 + $0x248] sm:$0xff]  ;;  %v378_v14 = vpack.c.bf16 %v255_v11, %v254_v10  ;;  %v256_v16 = vld [vmem:[%s4328_s20 + $0x50] sm:$0xff] }
  0x6a   : > { %v410_v15 = vpack.c.bf16 %v319_v13, %v318_v12  ;;  %v257_v17 = vld [vmem:[%s4328_s20 + $0x58] sm:$0xff]  ;;  %v320_v18 = vld [vmem:[%s4328_s20 + $0x250] sm:$0xff]  ;;  %v258_v22 = vld [vmem:[%s4328_s20 + $0x60] sm:$0xff] }
  0x6b   : > { %v321_v19 = vld [vmem:[%s4328_s20 + $0x258] sm:$0xff]  ;;  %v379_v20 = vpack.c.bf16 %v257_v17, %v256_v16  ;;  %v259_v23 = vld [vmem:[%s4328_s20 + $0x68] sm:$0xff]  ;;  %v322_v24 = vld [vmem:[%s4328_s20 + $0x260] sm:$0xff] }
  0x6c   : > { %507 = vmatpush1.bf16.msra.mxu0 %v478_v32  ;;  %3914 = vmatpush1.bf16.msra.mxu1 %v478_v32  ;;  %v411_v21 = vpack.c.bf16 %v321_v19, %v320_v18  ;;  %v323_v25 = vld [vmem:[%s4328_s20 + $0x268] sm:$0xff]  ;;  %v380_v26 = vpack.c.bf16 %v259_v23, %v258_v22  ;;  %v260_v28 = vld [vmem:[%s4328_s20 + $0x70] sm:$0xff]  ;;  %v261_v29 = vld [vmem:[%s4328_s20 + $0x78] sm:$0xff] }
  0x6d   : > { %508 = vmatprep.subr.bf16.mxu0 %v481_v33  ;;  %3907 = vmatprep.subr.bf16.mxu1 %v481_v33  ;;  %v412_v27 = vpack.c.bf16 %v323_v25, %v322_v24  ;;  %v324_v30 = vld [vmem:[%s4328_s20 + $0x270] sm:$0xff]  ;;  %v325_v31 = vld [vmem:[%s4328_s20 + $0x278] sm:$0xff]  ;;  %v381_v32 = vpack.c.bf16 %v261_v29, %v260_v28  ;;  %v262_v34 = vld [vmem:[%s4328_s20 + $0x80] sm:$0xff] }
  0x6e   : > { %v413_v33 = vpack.c.bf16 %v325_v31, %v324_v30  ;;  %v263_v35 = vld [vmem:[%s4328_s20 + $0x88] sm:$0xff]  ;;  %v326_v36 = vld [vmem:[%s4328_s20 + $0x280] sm:$0xff]  ;;  %v264_v40 = vld [vmem:[%s4328_s20 + $0x90] sm:$0xff] }
  0x6f   : > { %v327_v37 = vld [vmem:[%s4328_s20 + $0x288] sm:$0xff]  ;;  %v265_v41 = vld [vmem:[%s4328_s20 + $0x98] sm:$0xff]  ;;  %v328_v42 = vld [vmem:[%s4328_s20 + $0x290] sm:$0xff] }
  0x70   : > { %509 = vmatpush1.bf16.msra.mxu0 %v480_v38  ;;  %3915 = vmatpush1.bf16.msra.mxu1 %v480_v38  ;;  %v382_v38 = vpack.c.bf16 %v263_v35, %v262_v34  ;;  %v329_v43 = vld [vmem:[%s4328_s20 + $0x298] sm:$0xff]  ;;  %v266_v46 = vld [vmem:[%s4328_s20 + $0xa0] sm:$0xff]  ;;  %v267_v47 = vld [vmem:[%s4328_s20 + $0xa8] sm:$0xff] }
  0x71   : > { %510 = vmatprep.subr.bf16.mxu0 %v483_v39  ;;  %3908 = vmatprep.subr.bf16.mxu1 %v483_v39  ;;  %v414_v39 = vpack.c.bf16 %v327_v37, %v326_v36  ;;  %v330_v48 = vld [vmem:[%s4328_s20 + $0x2a0] sm:$0xff]  ;;  %v384_v50 = vpack.c.bf16 %v267_v47, %v266_v46  ;;  %v268_v52 = vld [vmem:[%s4328_s20 + $0xb0] sm:$0xff]  ;;  %v333_v55 = vld [vmem:[%s4328_s20 + $0x2b8] sm:$0xff] }
  0x72   : > { %v270_v58 = vld [vmem:[%s4328_s20 + $0xc0] sm:$0xff]  ;;  %v335_v61 = vld [vmem:[%s4328_s20 + $0x2c8] sm:$0xff]  ;;  %v272_v1 = vld [vmem:[%s4328_s20 + $0xd0] sm:$0xff] }
  0x73   : > { %v337_v4 = vld [vmem:[%s4328_s20 + $0x2d8] sm:$0xff]  ;;  %v274_v7 = vld [vmem:[%s4328_s20 + $0xe0] sm:$0xff]  ;;  %v339_v10 = vld [vmem:[%s4328_s20 + $0x2e8] sm:$0xff] }
  0x74   : > { %511 = vmatpush1.bf16.msra.mxu0 %v482_v44  ;;  %3916 = vmatpush1.bf16.msra.mxu1 %v482_v44  ;;  %v383_v44 = vpack.c.bf16 %v265_v41, %v264_v40  ;;  %v276_v13 = vld [vmem:[%s4328_s20 + $0xf0] sm:$0xff]  ;;  %v341_v16 = vld [vmem:[%s4328_s20 + $0x2f8] sm:$0xff]  ;;  %v278_v19 = vld [vmem:[%s4328_s20 + $0x100] sm:$0xff] }
  0x75   : > { %512 = vmatprep.subr.bf16.mxu0 %v485_v45  ;;  %3909 = vmatprep.subr.bf16.mxu1 %v485_v45  ;;  %v415_v45 = vpack.c.bf16 %v329_v43, %v328_v42  ;;  %v343_v22 = vld [vmem:[%s4328_s20 + $0x308] sm:$0xff]  ;;  %v280_v25 = vld [vmem:[%s4328_s20 + $0x110] sm:$0xff]  ;;  %v345_v28 = vld [vmem:[%s4328_s20 + $0x318] sm:$0xff] }
  0x76   : > { %v282_v31 = vld [vmem:[%s4328_s20 + $0x120] sm:$0xff]  ;;  %v347_v34 = vld [vmem:[%s4328_s20 + $0x328] sm:$0xff]  ;;  %v284_v37 = vld [vmem:[%s4328_s20 + $0x130] sm:$0xff] }
  0x77   : > { %v349_v40 = vld [vmem:[%s4328_s20 + $0x338] sm:$0xff]  ;;  %v286_v43 = vld [vmem:[%s4328_s20 + $0x140] sm:$0xff]  ;;  %v351_v46 = vld [vmem:[%s4328_s20 + $0x348] sm:$0xff] }
  0x78   : > { %513 = vmatpush1.bf16.msra.mxu0 %v484_v49  ;;  %3917 = vmatpush1.bf16.msra.mxu1 %v484_v49  ;;  %v331_v49 = vld [vmem:[%s4328_s20 + $0x2a8] sm:$0xff] }
  0x79   : > { %v416_v51 = vpack.c.bf16 %v331_v49, %v330_v48  ;;  %v288_v49 = vld [vmem:[%s4328_s20 + $0x150] sm:$0xff] }
  0x7b   : > { %531 = vmatmul.mubr.bf16.vlgmr.msra.gmra.mrb[0].mxu0 %v374_v53  ;;  %851 = vmatmul.mubr.bf16.vlgmr.msra.gmra.mrb[0].mxu1 %v406_v54  ;;  %v269_v53 = vld [vmem:[%s4328_s20 + $0xb8] sm:$0xff]  ;;  %v332_v54 = vld [vmem:[%s4328_s20 + $0x2b0] sm:$0xff] }
  0x7c   : > { %540 = vmatprep.mubr.bf16.mxu0 %v4155_v0  ;;  %860 = vmatprep.mubr.bf16.mxu1 %v4155_v0  ;;  %v385_v56 = vpack.c.bf16 %v269_v53, %v268_v52  ;;  %v417_v57 = vpack.c.bf16 %v333_v55, %v332_v54  ;;  %v353_v52 = vld [vmem:[%s4328_s20 + $0x358] sm:$0xff]  ;;  %v290_v55 = vld [vmem:[%s4328_s20 + $0x160] sm:$0xff] }
  0x83   : > { %541 = vmatmul.mubr.bf16.gmra.mrb[4].mxu0 %v375_v59  ;;  %861 = vmatmul.mubr.bf16.gmra.mrb[4].mxu1 %v407_v60  ;;  %v271_v59 = vld [vmem:[%s4328_s20 + $0xc8] sm:$0xff]  ;;  %v334_v60 = vld [vmem:[%s4328_s20 + $0x2c0] sm:$0xff] }
  0x84   : > { %550 = vmatprep.mubr.bf16.mxu0 %v4155_v0  ;;  %870 = vmatprep.mubr.bf16.mxu1 %v4155_v0  ;;  %v386_v62 = vpack.c.bf16 %v271_v59, %v270_v58  ;;  %v418_v63 = vpack.c.bf16 %v335_v61, %v334_v60  ;;  %v355_v58 = vld [vmem:[%s4328_s20 + $0x368] sm:$0xff]  ;;  %v292_v61 = vld [vmem:[%s4328_s20 + $0x170] sm:$0xff] }
  0x8b   : > { %551 = vmatmul.mubr.bf16.gmra.mrb[8].mxu0 %v376_v2  ;;  %871 = vmatmul.mubr.bf16.gmra.mrb[8].mxu1 %v408_v3  ;;  %v273_v2 = vld [vmem:[%s4328_s20 + $0xd8] sm:$0xff]  ;;  %v336_v3 = vld [vmem:[%s4328_s20 + $0x2d0] sm:$0xff] }
  0x8c   : > { %560 = vmatprep.mubr.bf16.mxu0 %v4155_v0  ;;  %880 = vmatprep.mubr.bf16.mxu1 %v4155_v0  ;;  %v387_v5 = vpack.c.bf16 %v273_v2, %v272_v1  ;;  %v419_v6 = vpack.c.bf16 %v337_v4, %v336_v3  ;;  %v357_v1 = vld [vmem:[%s4328_s20 + $0x378] sm:$0xff]  ;;  %v294_v4 = vld [vmem:[%s4328_s20 + $0x180] sm:$0xff] }
  0x93   : > { %561 = vmatmul.mubr.bf16.gmra.mrb[12].mxu0 %v377_v8  ;;  %881 = vmatmul.mubr.bf16.gmra.mrb[12].mxu1 %v409_v9  ;;  %v275_v8 = vld [vmem:[%s4328_s20 + $0xe8] sm:$0xff]  ;;  %v338_v9 = vld [vmem:[%s4328_s20 + $0x2e0] sm:$0xff] }
  0x94   : > { %570 = vmatprep.mubr.bf16.mxu0 %v4155_v0  ;;  %890 = vmatprep.mubr.bf16.mxu1 %v4155_v0  ;;  %v388_v11 = vpack.c.bf16 %v275_v8, %v274_v7  ;;  %v420_v12 = vpack.c.bf16 %v339_v10, %v338_v9  ;;  %v359_v7 = vld [vmem:[%s4328_s20 + $0x388] sm:$0xff]  ;;  %v296_v10 = vld [vmem:[%s4328_s20 + $0x190] sm:$0xff] }
  0x9b   : > { %571 = vmatmul.mubr.bf16.gmra.mrb[16].mxu0 %v378_v14  ;;  %891 = vmatmul.mubr.bf16.gmra.mrb[16].mxu1 %v410_v15  ;;  %v277_v14 = vld [vmem:[%s4328_s20 + $0xf8] sm:$0xff]  ;;  %v340_v15 = vld [vmem:[%s4328_s20 + $0x2f0] sm:$0xff] }
  0x9c   : > { %580 = vmatprep.mubr.bf16.mxu0 %v4155_v0  ;;  %900 = vmatprep.mubr.bf16.mxu1 %v4155_v0  ;;  %v389_v17 = vpack.c.bf16 %v277_v14, %v276_v13  ;;  %v421_v18 = vpack.c.bf16 %v341_v16, %v340_v15  ;;  %v361_v13 = vld [vmem:[%s4328_s20 + $0x398] sm:$0xff]  ;;  %v488_v16 = vlaneseq }
  0xa3   : > { %581 = vmatmul.mubr.bf16.gmra.mrb[20].mxu0 %v379_v20  ;;  %901 = vmatmul.mubr.bf16.gmra.mrb[20].mxu1 %v411_v21  ;;  %v279_v20 = vld [vmem:[%s4328_s20 + $0x108] sm:$0xff]  ;;  %v342_v21 = vld [vmem:[%s4328_s20 + $0x300] sm:$0xff] }
  0xa4   : > { %590 = vmatprep.mubr.bf16.mxu0 %v4155_v0  ;;  %910 = vmatprep.mubr.bf16.mxu1 %v4155_v0  ;;  %v390_v23 = vpack.c.bf16 %v279_v20, %v278_v19  ;;  %v422_v24 = vpack.c.bf16 %v343_v22, %v342_v21  ;;  %v362_v19 = vld [vmem:[%s4328_s20 + $0x3a0] sm:$0xff]  ;;  %v363_v20 = vld [vmem:[%s4328_s20 + $0x3a8] sm:$0xff]  ;;  %v489_v21 = vshrl.u32 %v488_v16, 7  ;;  %v304_v16 = vld [vmem:[%s4328_s20 + $0x1d0] sm:$0xff] }
  0xab   : > { %591 = vmatmul.mubr.bf16.gmra.mrb[24].mxu0 %v380_v26  ;;  %911 = vmatmul.mubr.bf16.gmra.mrb[24].mxu1 %v412_v27  ;;  %v281_v26 = vld [vmem:[%s4328_s20 + $0x118] sm:$0xff]  ;;  %v344_v27 = vld [vmem:[%s4328_s20 + $0x310] sm:$0xff] }
  0xac   : > { %600 = vmatprep.mubr.bf16.mxu0 %v4155_v0  ;;  %920 = vmatprep.mubr.bf16.mxu1 %v4155_v0  ;;  %v391_v29 = vpack.c.bf16 %v281_v26, %v280_v25  ;;  %v423_v30 = vpack.c.bf16 %v345_v28, %v344_v27  ;;  %v486_v25 = vld [vmem:[%s5021_s2] sm:$0x3]  ;;  %v494_v26 = vsub.s32 1, %v489_v21  ;;  %v300_v27 = vld [vmem:[%s4328_s20 + $0x1b0] sm:$0xff]  ;;  %v301_v28 = vld [vmem:[%s4328_s20 + $0x1b8] sm:$0xff] }
  0xb3   : > { %601 = vmatmul.mubr.bf16.gmra.mrb[28].mxu0 %v381_v32  ;;  %921 = vmatmul.mubr.bf16.gmra.mrb[28].mxu1 %v413_v33  ;;  %v283_v32 = vld [vmem:[%s4328_s20 + $0x128] sm:$0xff]  ;;  %v346_v33 = vld [vmem:[%s4328_s20 + $0x320] sm:$0xff] }
  0xb4   : > { %610 = vmatprep.mubr.bf16.mxu0 %v4155_v0  ;;  %930 = vmatprep.mubr.bf16.mxu1 %v4155_v0  ;;  %v392_v35 = vpack.c.bf16 %v283_v32, %v282_v31  ;;  %v424_v36 = vpack.c.bf16 %v347_v34, %v346_v33  ;;  %v4511_v34 = vrot.slane %v486_v25, %v494_v26 }
  0xbb   : > { %611 = vmatmul.mubr.bf16.gmra.mrb[32].mxu0 %v382_v38  ;;  %931 = vmatmul.mubr.bf16.gmra.mrb[32].mxu1 %v414_v39  ;;  %v285_v38 = vld [vmem:[%s4328_s20 + $0x138] sm:$0xff]  ;;  %v348_v39 = vld [vmem:[%s4328_s20 + $0x330] sm:$0xff] }
  0xbc   : > { %620 = vmatprep.mubr.bf16.mxu0 %v4155_v0  ;;  %940 = vmatprep.mubr.bf16.mxu1 %v4155_v0  ;;  %v393_v41 = vpack.c.bf16 %v285_v38, %v284_v37  ;;  %v425_v42 = vpack.c.bf16 %v349_v40, %v348_v39  ;;  %v401_v37 = vpack.c.bf16 %v301_v28, %v300_v27 }
  0xc3   : > { %621 = vmatmul.mubr.bf16.gmra.mrb[36].mxu0 %v383_v44  ;;  %941 = vmatmul.mubr.bf16.gmra.mrb[36].mxu1 %v415_v45  ;;  %v287_v44 = vld [vmem:[%s4328_s20 + $0x148] sm:$0xff]  ;;  %v350_v45 = vld [vmem:[%s4328_s20 + $0x340] sm:$0xff] }
  0xc4   : > { %630 = vmatprep.mubr.bf16.mxu0 %v4155_v0  ;;  %950 = vmatprep.mubr.bf16.mxu1 %v4155_v0  ;;  %v394_v47 = vpack.c.bf16 %v287_v44, %v286_v43  ;;  %v426_v48 = vpack.c.bf16 %v351_v46, %v350_v45 }
  0xcb   : > { %631 = vmatmul.mubr.bf16.gmra.mrb[40].mxu0 %v384_v50  ;;  %951 = vmatmul.mubr.bf16.gmra.mrb[40].mxu1 %v416_v51  ;;  %v289_v50 = vld [vmem:[%s4328_s20 + $0x158] sm:$0xff]  ;;  %v352_v51 = vld [vmem:[%s4328_s20 + $0x350] sm:$0xff] }
  0xcc   : > { %640 = vmatprep.mubr.bf16.mxu0 %v4155_v0  ;;  %960 = vmatprep.mubr.bf16.mxu1 %v4155_v0  ;;  %v395_v53 = vpack.c.bf16 %v289_v50, %v288_v49  ;;  %v427_v54 = vpack.c.bf16 %v353_v52, %v352_v51 }
  0xd3   : > { %641 = vmatmul.mubr.bf16.gmra.mrb[44].mxu0 %v385_v56  ;;  %961 = vmatmul.mubr.bf16.gmra.mrb[44].mxu1 %v417_v57  ;;  %v291_v56 = vld [vmem:[%s4328_s20 + $0x168] sm:$0xff]  ;;  %v354_v57 = vld [vmem:[%s4328_s20 + $0x360] sm:$0xff] }
  0xd4   : > { %650 = vmatprep.mubr.bf16.mxu0 %v4155_v0  ;;  %970 = vmatprep.mubr.bf16.mxu1 %v4155_v0  ;;  %v396_v59 = vpack.c.bf16 %v291_v56, %v290_v55  ;;  %v428_v60 = vpack.c.bf16 %v355_v58, %v354_v57  ;;  %v303_v56 = vld [vmem:[%s4328_s20 + $0x1c8] sm:$0xff]  ;;  %v366_v57 = vld [vmem:[%s4328_s20 + $0x3c0] sm:$0xff] }
  0xd5   : > { %v367_v58 = vld [vmem:[%s4328_s20 + $0x3c8] sm:$0xff] }
  0xdb   : > { %651 = vmatmul.mubr.bf16.gmra.mrb[48].mxu0 %v386_v62  ;;  %971 = vmatmul.mubr.bf16.gmra.mrb[48].mxu1 %v418_v63  ;;  %v293_v62 = vld [vmem:[%s4328_s20 + $0x178] sm:$0xff]  ;;  %v356_v63 = vld [vmem:[%s4328_s20 + $0x370] sm:$0xff] }
  0xdc   : > { %660 = vmatprep.mubr.bf16.mxu0 %v4155_v0  ;;  %980 = vmatprep.mubr.bf16.mxu1 %v4155_v0  ;;  %v397_v2 = vpack.c.bf16 %v293_v62, %v292_v61  ;;  %v429_v3 = vpack.c.bf16 %v357_v1, %v356_v63  ;;  %v434_v1 = vpack.c.bf16 %v367_v58, %v366_v57 }
  0xe3   : > { %661 = vmatmul.mubr.bf16.gmra.mrb[52].mxu0 %v387_v5  ;;  %981 = vmatmul.mubr.bf16.gmra.mrb[52].mxu1 %v419_v6  ;;  %v295_v5 = vld [vmem:[%s4328_s20 + $0x188] sm:$0xff]  ;;  %v358_v6 = vld [vmem:[%s4328_s20 + $0x380] sm:$0xff] }
  0xe4   : > { %670 = vmatprep.mubr.bf16.mxu0 %v4155_v0  ;;  %990 = vmatprep.mubr.bf16.mxu1 %v4155_v0  ;;  %v398_v8 = vpack.c.bf16 %v295_v5, %v294_v4  ;;  %v430_v9 = vpack.c.bf16 %v359_v7, %v358_v6 }
  0xeb   : > { %671 = vmatmul.mubr.bf16.gmra.mrb[56].mxu0 %v388_v11  ;;  %991 = vmatmul.mubr.bf16.gmra.mrb[56].mxu1 %v420_v12  ;;  %v297_v11 = vld [vmem:[%s4328_s20 + $0x198] sm:$0xff]  ;;  %v360_v12 = vld [vmem:[%s4328_s20 + $0x390] sm:$0xff] }
  0xec   : > { %680 = vmatprep.mubr.bf16.mxu0 %v4155_v0  ;;  %1000 = vmatprep.mubr.bf16.mxu1 %v4155_v0  ;;  %v399_v14 = vpack.c.bf16 %v297_v11, %v296_v10  ;;  %v431_v15 = vpack.c.bf16 %v361_v13, %v360_v12 }
  0xf3   : > { %681 = vmatmul.mubr.bf16.gmra.mrb[60].mxu0 %v389_v17  ;;  %1001 = vmatmul.mubr.bf16.gmra.mrb[60].mxu1 %v421_v18  ;;  %v298_v17 = vld [vmem:[%s4328_s20 + $0x1a0] sm:$0xff]  ;;  %v299_v18 = vld [vmem:[%s4328_s20 + $0x1a8] sm:$0xff] }
  0xf4   : > { %690 = vmatprep.mubr.bf16.mxu0 %v4155_v0  ;;  %1010 = vmatprep.mubr.bf16.mxu1 %v4155_v0  ;;  %v400_v22 = vpack.c.bf16 %v299_v18, %v298_v17 }
  0xfb   : > { %691 = vmatmul.mubr.bf16.gmra.mrb[64].mxu0 %v390_v23  ;;  %1011 = vmatmul.mubr.bf16.gmra.mrb[64].mxu1 %v422_v24  ;;  %v432_v23 = vpack.c.bf16 %v363_v20, %v362_v19  ;;  %v490_v24 = vsub.s32 0, %v489_v21  ;;  %v305_v19 = vld [vmem:[%s4328_s20 + $0x1d8] sm:$0xff]  ;;  %v368_v20 = vld [vmem:[%s4328_s20 + $0x3d0] sm:$0xff] }
  0xfc   : > { %700 = vmatprep.mubr.bf16.mxu0 %v4155_v0  ;;  %1020 = vmatprep.mubr.bf16.mxu1 %v4155_v0  ;;  %v369_v21 = vld [vmem:[%s4328_s20 + $0x3d8] sm:$0xff]  ;;  %v403_v26 = vpack.c.bf16 %v305_v19, %v304_v16 }
  0xfd   : > { %v4509_v31 = vrot.slane %v486_v25, %v490_v24  ;;  %v435_v27 = vpack.c.bf16 %v369_v21, %v368_v20 }
 0x103   : > { %701 = vmatmul.mubr.bf16.gmra.mrb[68].mxu0 %v391_v29  ;;  %1021 = vmatmul.mubr.bf16.gmra.mrb[68].mxu1 %v423_v30  ;;  %v364_v29 = vld [vmem:[%s4328_s20 + $0x3b0] sm:$0xff]  ;;  %v365_v30 = vld [vmem:[%s4328_s20 + $0x3b8] sm:$0xff] }
 0x104   : > { %710 = vmatprep.mubr.bf16.mxu0 %v4155_v0  ;;  %1030 = vmatprep.mubr.bf16.mxu1 %v4155_v0  ;;  %v433_v38 = vpack.c.bf16 %v365_v30, %v364_v29 }
 0x10b   : > { %711 = vmatmul.mubr.bf16.gmra.mrb[72].mxu0 %v392_v35  ;;  %1031 = vmatmul.mubr.bf16.gmra.mrb[72].mxu1 %v424_v36 }
 0x10c   : > { %720 = vmatprep.mubr.bf16.mxu0 %v4155_v0  ;;  %1040 = vmatprep.mubr.bf16.mxu1 %v4155_v0 }
 0x113   : > { %721 = vmatmul.mubr.bf16.gmra.mrb[76].mxu0 %v393_v41  ;;  %1041 = vmatmul.mubr.bf16.gmra.mrb[76].mxu1 %v425_v42 }
 0x114   : > { %730 = vmatprep.mubr.bf16.mxu0 %v4155_v0  ;;  %1050 = vmatprep.mubr.bf16.mxu1 %v4155_v0 }
 0x11b   : > { %731 = vmatmul.mubr.bf16.gmra.mrb[80].mxu0 %v394_v47  ;;  %1051 = vmatmul.mubr.bf16.gmra.mrb[80].mxu1 %v426_v48 }
 0x11c   : > { %740 = vmatprep.mubr.bf16.mxu0 %v4155_v0  ;;  %1060 = vmatprep.mubr.bf16.mxu1 %v4155_v0 }
 0x123   : > { %741 = vmatmul.mubr.bf16.gmra.mrb[84].mxu0 %v395_v53  ;;  %1061 = vmatmul.mubr.bf16.gmra.mrb[84].mxu1 %v427_v54  ;;  %v302_v53 = vld [vmem:[%s4328_s20 + $0x1c0] sm:$0xff] }
 0x124   : > { %750 = vmatprep.mubr.bf16.mxu0 %v4155_v0  ;;  %1070 = vmatprep.mubr.bf16.mxu1 %v4155_v0  ;;  %v402_v63 = vpack.c.bf16 %v303_v56, %v302_v53 }
 0x12b   : > { %751 = vmatmul.mubr.bf16.gmra.mrb[88].mxu0 %v396_v59  ;;  %1071 = vmatmul.mubr.bf16.gmra.mrb[88].mxu1 %v428_v60 }
 0x12c   : > { %760 = vmatprep.mubr.bf16.mxu0 %v4155_v0  ;;  %1080 = vmatprep.mubr.bf16.mxu1 %v4155_v0 }
 0x133   : > { %761 = vmatmul.mubr.bf16.gmra.mrb[92].mxu0 %v397_v2  ;;  %1081 = vmatmul.mubr.bf16.gmra.mrb[92].mxu1 %v429_v3 }
 0x134   : > { %770 = vmatprep.mubr.bf16.mxu0 %v4155_v0  ;;  %1090 = vmatprep.mubr.bf16.mxu1 %v4155_v0 }
 0x13b   : > { %771 = vmatmul.mubr.bf16.gmra.mrb[96].mxu0 %v398_v8  ;;  %1091 = vmatmul.mubr.bf16.gmra.mrb[96].mxu1 %v430_v9 }
 0x13c   : > { %780 = vmatprep.mubr.bf16.mxu0 %v4155_v0  ;;  %1100 = vmatprep.mubr.bf16.mxu1 %v4155_v0 }
 0x143   : > { %781 = vmatmul.mubr.bf16.gmra.mrb[100].mxu0 %v399_v14  ;;  %1101 = vmatmul.mubr.bf16.gmra.mrb[100].mxu1 %v431_v15 }
 0x144   : > { %790 = vmatprep.mubr.bf16.mxu0 %v4155_v0  ;;  %1110 = vmatprep.mubr.bf16.mxu1 %v4155_v0 }
 0x14b   : > { %791 = vmatmul.mubr.bf16.gmra.mrb[104].mxu0 %v400_v22  ;;  %1111 = vmatmul.mubr.bf16.gmra.mrb[104].mxu1 %v432_v23 }
 0x14c   : > { %800 = vmatprep.mubr.bf16.mxu0 %v4155_v0  ;;  %1120 = vmatprep.mubr.bf16.mxu1 %v4155_v0 }
 0x14e   : > { %v532_v32 = vpop.f32.mrb[0].mxu0  ;;  %v852_v33 = vpop.f32.mrb[0].mxu1 }
 0x14f   : > { %v534_v35 = vpop.f32.mrb[1].mxu0  ;;  %v854_v36 = vpop.f32.mrb[1].mxu1  ;;  %v533_v41 = vadd.f32 %v532_v32, %v4509_v31  ;;  %v853_v42 = vadd.f32 %v852_v33, %v4509_v31 }
 0x150   : > { %v536_v39 = vpop.f32.mrb[2].mxu0  ;;  %v856_v40 = vpop.f32.mrb[2].mxu1  ;;  %v535_v47 = vadd.f32 %v534_v35, %v4511_v34  ;;  %v855_v48 = vadd.f32 %v854_v36, %v4511_v34 }
 0x151   : > { %v537_v43 = vadd.f32 %v536_v39, %v4509_v31  ;;  %v857_v44 = vadd.f32 %v856_v40, %v4509_v31  ;;  %v538_v45 = vpop.f32.mrb[3].mxu0  ;;  %v858_v46 = vpop.f32.mrb[3].mxu1 }
 0x152   : > { %v539_v49 = vadd.f32 %v538_v45, %v4511_v34  ;;  %v859_v50 = vadd.f32 %v858_v46, %v4511_v34 }
 0x153   : > { %v3139_v51 = vpack.c.bf16 %v537_v43, %v533_v41  ;;  %v3299_v52 = vpack.c.bf16 %v857_v44, %v853_v42  ;;  %801 = vmatmul.mubr.bf16.gmra.mrb[108].mxu0 %v401_v37  ;;  %1121 = vmatmul.mubr.bf16.gmra.mrb[108].mxu1 %v433_v38  ;;  %v306_v44 = vld [vmem:[%s4328_s20 + $0x1e0] sm:$0xff] }
 0x154   : > { %v3459_v54 = vpack.c.bf16 %v539_v49, %v535_v47  ;;  %v3619_v55 = vpack.c.bf16 %v859_v50, %v855_v48  ;;  %810 = vmatprep.mubr.bf16.mxu0 %v4155_v0  ;;  %1130 = vmatprep.mubr.bf16.mxu1 %v4155_v0  ;;  %v307_v47 = vld [vmem:[%s4328_s20 + $0x1e8] sm:$0xff]  ;;  %v370_v48 = vld [vmem:[%s4328_s20 + $0x3e0] sm:$0xff] }
 0x155   : > { %3140 = vst [vmem:[%s4530_s28] sm:$0xff] %v3139_v51   ;;  %3807 = vst [vmem:[%s4530_s28 + $0x100] sm:$0xff] %v3299_v52   ;;  %v371_v49 = vld [vmem:[%s4328_s20 + $0x3e8] sm:$0xff] }
 0x156   : > { %3460 = vst [vmem:[%s4536_s29] sm:$0xff] %v3459_v54   ;;  %3870 = vst [vmem:[%s4536_s29 + $0x100] sm:$0xff] %v3619_v55   ;;  %v542_v59 = vpop.f32.mrb[4].mxu0  ;;  %v862_v60 = vpop.f32.mrb[4].mxu1  ;;  %v404_v54 = vpack.c.bf16 %v307_v47, %v306_v44  ;;  %v436_v55 = vpack.c.bf16 %v371_v49, %v370_v48 }
 0x157   : > { %v544_v61 = vpop.f32.mrb[5].mxu0  ;;  %v864_v62 = vpop.f32.mrb[5].mxu1  ;;  %v543_v4 = vadd.f32 %v542_v59, %v4509_v31  ;;  %v863_v5 = vadd.f32 %v862_v60, %v4509_v31 }
 0x158   : > { %v546_v2 = vpop.f32.mrb[6].mxu0  ;;  %v866_v3 = vpop.f32.mrb[6].mxu1  ;;  %v545_v10 = vadd.f32 %v544_v61, %v4511_v34  ;;  %v865_v11 = vadd.f32 %v864_v62, %v4511_v34 }
 0x159   : > { %v547_v6 = vadd.f32 %v546_v2, %v4509_v31  ;;  %v867_v7 = vadd.f32 %v866_v3, %v4509_v31  ;;  %v548_v8 = vpop.f32.mrb[7].mxu0  ;;  %v868_v9 = vpop.f32.mrb[7].mxu1 }
 0x15a   : > { %v549_v12 = vadd.f32 %v548_v8, %v4511_v34  ;;  %v869_v13 = vadd.f32 %v868_v9, %v4511_v34 }
 0x15b   : > { %v3144_v14 = vpack.c.bf16 %v547_v6, %v543_v4  ;;  %v3304_v15 = vpack.c.bf16 %v867_v7, %v863_v5  ;;  %811 = vmatmul.mubr.bf16.gmra.mrb[112].mxu0 %v402_v63  ;;  %1131 = vmatmul.mubr.bf16.gmra.mrb[112].mxu1 %v434_v1  ;;  %v308_v7 = vld [vmem:[%s4328_s20 + $0x1f0] sm:$0xff] }
 0x15c   : > { %v3464_v17 = vpack.c.bf16 %v549_v12, %v545_v10  ;;  %v3624_v18 = vpack.c.bf16 %v869_v13, %v865_v11  ;;  %820 = vmatprep.mubr.bf16.mxu0 %v4155_v0  ;;  %1140 = vmatprep.mubr.bf16.mxu1 %v4155_v0  ;;  %v309_v10 = vld [vmem:[%s4328_s20 + $0x1f8] sm:$0xff]  ;;  %v372_v11 = vld [vmem:[%s4328_s20 + $0x3f0] sm:$0xff] }
 0x15d   : > { %3776 = vst [vmem:[%s4530_s28 + $0x8] sm:$0xff] %v3144_v14   ;;  %3808 = vst [vmem:[%s4530_s28 + $0x108] sm:$0xff] %v3304_v15   ;;  %v373_v12 = vld [vmem:[%s4328_s20 + $0x3f8] sm:$0xff]  ;;  %s4156_s20 = smov [#allocation7]  }
 0x15e   : > { %3839 = vst [vmem:[%s4536_s29 + $0x8] sm:$0xff] %v3464_v17   ;;  %3871 = vst [vmem:[%s4536_s29 + $0x108] sm:$0xff] %v3624_v18   ;;  %v552_v22 = vpop.f32.mrb[8].mxu0  ;;  %v872_v23 = vpop.f32.mrb[8].mxu1  ;;  %v405_v17 = vpack.c.bf16 %v309_v10, %v308_v7  ;;  %v437_v18 = vpack.c.bf16 %v373_v12, %v372_v11  ;;  %s4049_s21 = sshll.u32 %s4156_s20, 4  ;;  %s4050_s21 = int_to_ptr.vmem [resolvable:$false] %s4049_s21 }
 0x15f   : > { %v554_v24 = vpop.f32.mrb[9].mxu0  ;;  %v874_v25 = vpop.f32.mrb[9].mxu1  ;;  %v553_v30 = vadd.f32 %v552_v22, %v4509_v31  ;;  %v873_v32 = vadd.f32 %v872_v23, %v4509_v31  ;;  %s4051_s23 = scalar_lea.vmem %s4050_s21, 16384  ;;  %p4052_p10 = scmp.lt.s32.totalorder %s4934_s6, %s4050_s21 }
 0x160   : > { %v556_v28 = vpop.f32.mrb[10].mxu0  ;;  %v876_v29 = vpop.f32.mrb[10].mxu1  ;;  %v555_v38 = vadd.f32 %v554_v24, %v4511_v34  ;;  %v875_v39 = vadd.f32 %v874_v25, %v4511_v34  ;;  %p4053_p13 = scmp.lt.s32.totalorder %s4051_s23, %s4045_s14 }
 0x161   : > { %v557_v33 = vadd.f32 %v556_v28, %v4509_v31  ;;  %v877_v35 = vadd.f32 %v876_v29, %v4509_v31  ;;  %v558_v36 = vpop.f32.mrb[11].mxu0  ;;  %v878_v37 = vpop.f32.mrb[11].mxu1 }
 0x162   : > { %v559_v40 = vadd.f32 %v558_v36, %v4511_v34  ;;  %v879_v41 = vadd.f32 %v878_v37, %v4511_v34  ;;  %p4054_p3 = por %p4053_p13, %p4052_p10 }
 0x163   : > { %v3149_v42 = vpack.c.bf16 %v557_v33, %v553_v30  ;;  %v3309_v43 = vpack.c.bf16 %v877_v35, %v873_v32  ;;  %821 = vmatmul.mubr.bf16.gmra.mrb[116].mxu0 %v403_v26  ;;  %1141 = vmatmul.mubr.bf16.gmra.mrb[116].mxu1 %v435_v27 }
 0x164   : > { %v3469_v45 = vpack.c.bf16 %v559_v40, %v555_v38  ;;  %v3629_v46 = vpack.c.bf16 %v879_v41, %v875_v39  ;;  %830 = vmatprep.mubr.bf16.mxu0 %v4155_v0  ;;  %1150 = vmatprep.mubr.bf16.mxu1 %v4155_v0  ;;  %p4055_p7 = pnand %p4054_p3, %p4048_p8 }
 0x165   : > { %3777 = vst [vmem:[%s4530_s28 + $0x10] sm:$0xff] %v3149_v42   ;;  %3809 = vst [vmem:[%s4530_s28 + $0x110] sm:$0xff] %v3309_v43  }
 0x166   : > { %3840 = vst [vmem:[%s4536_s29 + $0x10] sm:$0xff] %v3469_v45   ;;  %3872 = vst [vmem:[%s4536_s29 + $0x110] sm:$0xff] %v3629_v46   ;;  %v562_v50 = vpop.f32.mrb[12].mxu0  ;;  %v882_v51 = vpop.f32.mrb[12].mxu1 }
 0x167   : > { %v564_v52 = vpop.f32.mrb[13].mxu0  ;;  %v884_v53 = vpop.f32.mrb[13].mxu1  ;;  %v563_v58 = vadd.f32 %v562_v50, %v4509_v31  ;;  %v883_v59 = vadd.f32 %v882_v51, %v4509_v31 }
 0x168   : > { %v566_v56 = vpop.f32.mrb[14].mxu0  ;;  %v886_v57 = vpop.f32.mrb[14].mxu1  ;;  %v565_v1 = vadd.f32 %v564_v52, %v4511_v34  ;;  %v885_v2 = vadd.f32 %v884_v53, %v4511_v34 }
 0x169   : > { %v567_v60 = vadd.f32 %v566_v56, %v4509_v31  ;;  %v887_v61 = vadd.f32 %v886_v57, %v4509_v31  ;;  %v568_v62 = vpop.f32.mrb[15].mxu0  ;;  %v888_v63 = vpop.f32.mrb[15].mxu1 }
 0x16a   : > { %v569_v3 = vadd.f32 %v568_v62, %v4511_v34  ;;  %v889_v4 = vadd.f32 %v888_v63, %v4511_v34 }
 0x16b   : > { %v3154_v5 = vpack.c.bf16 %v567_v60, %v563_v58  ;;  %v3314_v6 = vpack.c.bf16 %v887_v61, %v883_v59  ;;  %831 = vmatmul.mubr.bf16.gmra.mrb[120].mxu0 %v404_v54  ;;  %1151 = vmatmul.mubr.bf16.gmra.mrb[120].mxu1 %v436_v55 }
 0x16c   : > { %v3474_v8 = vpack.c.bf16 %v569_v3, %v565_v1  ;;  %v3634_v9 = vpack.c.bf16 %v889_v4, %v885_v2  ;;  %840 = vmatprep.mubr.bf16.mxu0 %v4155_v0  ;;  %1160 = vmatprep.mubr.bf16.mxu1 %v4155_v0 }
 0x16d   : > { %3778 = vst [vmem:[%s4530_s28 + $0x18] sm:$0xff] %v3154_v5   ;;  %3810 = vst [vmem:[%s4530_s28 + $0x118] sm:$0xff] %v3314_v6  }
 0x16e   : > { %3841 = vst [vmem:[%s4536_s29 + $0x18] sm:$0xff] %v3474_v8   ;;  %3873 = vst [vmem:[%s4536_s29 + $0x118] sm:$0xff] %v3634_v9   ;;  %v572_v13 = vpop.f32.mrb[16].mxu0  ;;  %v892_v14 = vpop.f32.mrb[16].mxu1 }
 0x16f   : > { %v574_v15 = vpop.f32.mrb[17].mxu0  ;;  %v894_v16 = vpop.f32.mrb[17].mxu1  ;;  %v573_v21 = vadd.f32 %v572_v13, %v4509_v31  ;;  %v893_v0 = vadd.f32 %v892_v14, %v4509_v31 }
 0x170   : > { %v576_v19 = vpop.f32.mrb[18].mxu0  ;;  %v896_v20 = vpop.f32.mrb[18].mxu1  ;;  %v575_v26 = vadd.f32 %v574_v15, %v4511_v34  ;;  %v895_v27 = vadd.f32 %v894_v16, %v4511_v34 }
 0x171   : > { %v577_v22 = vadd.f32 %v576_v19, %v4509_v31  ;;  %v897_v23 = vadd.f32 %v896_v20, %v4509_v31  ;;  %v578_v24 = vpop.f32.mrb[19].mxu0  ;;  %v898_v25 = vpop.f32.mrb[19].mxu1 }
 0x172   : > { %v579_v28 = vadd.f32 %v578_v24, %v4511_v34  ;;  %v899_v29 = vadd.f32 %v898_v25, %v4511_v34 }
 0x173   : > { %v3159_v30 = vpack.c.bf16 %v577_v22, %v573_v21  ;;  %v3319_v32 = vpack.c.bf16 %v897_v23, %v893_v0  ;;  %841 = vmatmul.mubr.bf16.gmra.mrb[124].mxu0 %v405_v17  ;;  %1161 = vmatmul.mubr.bf16.gmra.mrb[124].mxu1 %v437_v18 }
 0x174   : > { %v3479_v33 = vpack.c.bf16 %v579_v28, %v575_v26  ;;  %v3639_v35 = vpack.c.bf16 %v899_v29, %v895_v27 }
 0x175   : > { %3779 = vst [vmem:[%s4530_s28 + $0x20] sm:$0xff] %v3159_v30   ;;  %3811 = vst [vmem:[%s4530_s28 + $0x120] sm:$0xff] %v3319_v32  }
 0x176   : > { %3842 = vst [vmem:[%s4536_s29 + $0x20] sm:$0xff] %v3479_v33   ;;  %3874 = vst [vmem:[%s4536_s29 + $0x120] sm:$0xff] %v3639_v35   ;;  %v582_v36 = vpop.f32.mrb[20].mxu0  ;;  %v902_v37 = vpop.f32.mrb[20].mxu1 }
 0x177   : > { %v584_v38 = vpop.f32.mrb[21].mxu0  ;;  %v904_v39 = vpop.f32.mrb[21].mxu1  ;;  %v583_v42 = vadd.f32 %v582_v36, %v4509_v31  ;;  %v903_v43 = vadd.f32 %v902_v37, %v4509_v31 }
 0x178   : > { %v586_v40 = vpop.f32.mrb[22].mxu0  ;;  %v906_v41 = vpop.f32.mrb[22].mxu1  ;;  %v585_v48 = vadd.f32 %v584_v38, %v4511_v34  ;;  %v905_v49 = vadd.f32 %v904_v39, %v4511_v34 }
 0x179   : > { %v587_v44 = vadd.f32 %v586_v40, %v4509_v31  ;;  %v907_v45 = vadd.f32 %v906_v41, %v4509_v31  ;;  %v588_v46 = vpop.f32.mrb[23].mxu0  ;;  %v908_v47 = vpop.f32.mrb[23].mxu1 }
 0x17a   : > { %v589_v50 = vadd.f32 %v588_v46, %v4511_v34  ;;  %v909_v51 = vadd.f32 %v908_v47, %v4511_v34 }
 0x17b   : > { %v3164_v52 = vpack.c.bf16 %v587_v44, %v583_v42  ;;  %v3324_v53 = vpack.c.bf16 %v907_v45, %v903_v43 }
 0x17c   : > { %v3484_v54 = vpack.c.bf16 %v589_v50, %v585_v48  ;;  %v3644_v55 = vpack.c.bf16 %v909_v51, %v905_v49 }
 0x17d   : > { %3780 = vst [vmem:[%s4530_s28 + $0x28] sm:$0xff] %v3164_v52   ;;  %3812 = vst [vmem:[%s4530_s28 + $0x128] sm:$0xff] %v3324_v53  }
 0x17e   : > { %3843 = vst [vmem:[%s4536_s29 + $0x28] sm:$0xff] %v3484_v54   ;;  %3875 = vst [vmem:[%s4536_s29 + $0x128] sm:$0xff] %v3644_v55   ;;  %v592_v56 = vpop.f32.mrb[24].mxu0  ;;  %v912_v57 = vpop.f32.mrb[24].mxu1 }
 0x17f   : > { %v594_v58 = vpop.f32.mrb[25].mxu0  ;;  %v914_v59 = vpop.f32.mrb[25].mxu1  ;;  %v593_v62 = vadd.f32 %v592_v56, %v4509_v31  ;;  %v913_v63 = vadd.f32 %v912_v57, %v4509_v31 }
 0x180   : > { %v596_v60 = vpop.f32.mrb[26].mxu0  ;;  %v916_v61 = vpop.f32.mrb[26].mxu1  ;;  %v595_v5 = vadd.f32 %v594_v58, %v4511_v34  ;;  %v915_v6 = vadd.f32 %v914_v59, %v4511_v34 }
 0x181   : > { %v597_v1 = vadd.f32 %v596_v60, %v4509_v31  ;;  %v917_v2 = vadd.f32 %v916_v61, %v4509_v31  ;;  %v598_v3 = vpop.f32.mrb[27].mxu0  ;;  %v918_v4 = vpop.f32.mrb[27].mxu1 }
 0x182   : > { %v599_v7 = vadd.f32 %v598_v3, %v4511_v34  ;;  %v919_v8 = vadd.f32 %v918_v4, %v4511_v34 }
 0x183   : > { %v3169_v9 = vpack.c.bf16 %v597_v1, %v593_v62  ;;  %v3329_v10 = vpack.c.bf16 %v917_v2, %v913_v63 }
 0x184   : > { %v3489_v11 = vpack.c.bf16 %v599_v7, %v595_v5  ;;  %v3649_v12 = vpack.c.bf16 %v919_v8, %v915_v6 }
 0x185   : > { %3781 = vst [vmem:[%s4530_s28 + $0x30] sm:$0xff] %v3169_v9   ;;  %3813 = vst [vmem:[%s4530_s28 + $0x130] sm:$0xff] %v3329_v10  }
 0x186   : > { %3844 = vst [vmem:[%s4536_s29 + $0x30] sm:$0xff] %v3489_v11   ;;  %3876 = vst [vmem:[%s4536_s29 + $0x130] sm:$0xff] %v3649_v12   ;;  %v602_v13 = vpop.f32.mrb[28].mxu0  ;;  %v922_v14 = vpop.f32.mrb[28].mxu1 }
 0x187   : > { %v604_v15 = vpop.f32.mrb[29].mxu0  ;;  %v924_v16 = vpop.f32.mrb[29].mxu1  ;;  %v603_v19 = vadd.f32 %v602_v13, %v4509_v31  ;;  %v923_v20 = vadd.f32 %v922_v14, %v4509_v31 }
 0x188   : > { %v606_v17 = vpop.f32.mrb[30].mxu0  ;;  %v926_v18 = vpop.f32.mrb[30].mxu1  ;;  %v605_v24 = vadd.f32 %v604_v15, %v4511_v34  ;;  %v925_v25 = vadd.f32 %v924_v16, %v4511_v34 }
 0x189   : > { %v607_v21 = vadd.f32 %v606_v17, %v4509_v31  ;;  %v927_v0 = vadd.f32 %v926_v18, %v4509_v31  ;;  %v608_v22 = vpop.f32.mrb[31].mxu0  ;;  %v928_v23 = vpop.f32.mrb[31].mxu1 }
 0x18a   : > { %v609_v26 = vadd.f32 %v608_v22, %v4511_v34  ;;  %v929_v27 = vadd.f32 %v928_v23, %v4511_v34 }
 0x18b   : > { %v3174_v28 = vpack.c.bf16 %v607_v21, %v603_v19  ;;  %v3334_v29 = vpack.c.bf16 %v927_v0, %v923_v20 }
 0x18c   : > { %v3494_v30 = vpack.c.bf16 %v609_v26, %v605_v24  ;;  %v3654_v32 = vpack.c.bf16 %v929_v27, %v925_v25 }
 0x18d   : > { %3782 = vst [vmem:[%s4530_s28 + $0x38] sm:$0xff] %v3174_v28   ;;  %3814 = vst [vmem:[%s4530_s28 + $0x138] sm:$0xff] %v3334_v29  }
 0x18e   : > { %3845 = vst [vmem:[%s4536_s29 + $0x38] sm:$0xff] %v3494_v30   ;;  %3877 = vst [vmem:[%s4536_s29 + $0x138] sm:$0xff] %v3654_v32   ;;  %v612_v33 = vpop.f32.mrb[32].mxu0  ;;  %v932_v35 = vpop.f32.mrb[32].mxu1 }
 0x18f   : > { %v614_v36 = vpop.f32.mrb[33].mxu0  ;;  %v934_v37 = vpop.f32.mrb[33].mxu1  ;;  %v613_v40 = vadd.f32 %v612_v33, %v4509_v31  ;;  %v933_v41 = vadd.f32 %v932_v35, %v4509_v31 }
 0x190   : > { %v616_v38 = vpop.f32.mrb[34].mxu0  ;;  %v936_v39 = vpop.f32.mrb[34].mxu1  ;;  %v615_v46 = vadd.f32 %v614_v36, %v4511_v34  ;;  %v935_v47 = vadd.f32 %v934_v37, %v4511_v34 }
 0x191   : > { %v617_v42 = vadd.f32 %v616_v38, %v4509_v31  ;;  %v937_v43 = vadd.f32 %v936_v39, %v4509_v31  ;;  %v618_v44 = vpop.f32.mrb[35].mxu0  ;;  %v938_v45 = vpop.f32.mrb[35].mxu1 }
 0x192   : > { %v619_v48 = vadd.f32 %v618_v44, %v4511_v34  ;;  %v939_v49 = vadd.f32 %v938_v45, %v4511_v34 }
 0x193   : > { %v3179_v50 = vpack.c.bf16 %v617_v42, %v613_v40  ;;  %v3339_v51 = vpack.c.bf16 %v937_v43, %v933_v41 }
 0x194   : > { %v3499_v52 = vpack.c.bf16 %v619_v48, %v615_v46  ;;  %v3659_v53 = vpack.c.bf16 %v939_v49, %v935_v47 }
 0x195   : > { %3783 = vst [vmem:[%s4530_s28 + $0x40] sm:$0xff] %v3179_v50   ;;  %3815 = vst [vmem:[%s4530_s28 + $0x140] sm:$0xff] %v3339_v51  }
 0x196   : > { %3846 = vst [vmem:[%s4536_s29 + $0x40] sm:$0xff] %v3499_v52   ;;  %3878 = vst [vmem:[%s4536_s29 + $0x140] sm:$0xff] %v3659_v53   ;;  %v622_v54 = vpop.f32.mrb[36].mxu0  ;;  %v942_v55 = vpop.f32.mrb[36].mxu1 }
 0x197   : > { %v624_v56 = vpop.f32.mrb[37].mxu0  ;;  %v944_v57 = vpop.f32.mrb[37].mxu1  ;;  %v623_v60 = vadd.f32 %v622_v54, %v4509_v31  ;;  %v943_v61 = vadd.f32 %v942_v55, %v4509_v31 }
 0x198   : > { %v626_v58 = vpop.f32.mrb[38].mxu0  ;;  %v946_v59 = vpop.f32.mrb[38].mxu1  ;;  %v625_v3 = vadd.f32 %v624_v56, %v4511_v34  ;;  %v945_v4 = vadd.f32 %v944_v57, %v4511_v34 }
 0x199   : > { %v627_v62 = vadd.f32 %v626_v58, %v4509_v31  ;;  %v947_v63 = vadd.f32 %v946_v59, %v4509_v31  ;;  %v628_v1 = vpop.f32.mrb[39].mxu0  ;;  %v948_v2 = vpop.f32.mrb[39].mxu1 }
 0x19a   : > { %v629_v5 = vadd.f32 %v628_v1, %v4511_v34  ;;  %v949_v6 = vadd.f32 %v948_v2, %v4511_v34 }
 0x19b   : > { %v3184_v7 = vpack.c.bf16 %v627_v62, %v623_v60  ;;  %v3344_v8 = vpack.c.bf16 %v947_v63, %v943_v61 }
 0x19c   : > { %v3504_v9 = vpack.c.bf16 %v629_v5, %v625_v3  ;;  %v3664_v10 = vpack.c.bf16 %v949_v6, %v945_v4 }
 0x19d   : > { %3784 = vst [vmem:[%s4530_s28 + $0x48] sm:$0xff] %v3184_v7   ;;  %3816 = vst [vmem:[%s4530_s28 + $0x148] sm:$0xff] %v3344_v8  }
 0x19e   : > { %3847 = vst [vmem:[%s4536_s29 + $0x48] sm:$0xff] %v3504_v9   ;;  %3879 = vst [vmem:[%s4536_s29 + $0x148] sm:$0xff] %v3664_v10   ;;  %v632_v11 = vpop.f32.mrb[40].mxu0  ;;  %v952_v12 = vpop.f32.mrb[40].mxu1 }
 0x19f   : > { %v634_v13 = vpop.f32.mrb[41].mxu0  ;;  %v954_v14 = vpop.f32.mrb[41].mxu1  ;;  %v633_v17 = vadd.f32 %v632_v11, %v4509_v31  ;;  %v953_v18 = vadd.f32 %v952_v12, %v4509_v31 }
 0x1a0   : > { %v636_v15 = vpop.f32.mrb[42].mxu0  ;;  %v956_v16 = vpop.f32.mrb[42].mxu1  ;;  %v635_v22 = vadd.f32 %v634_v13, %v4511_v34  ;;  %v955_v23 = vadd.f32 %v954_v14, %v4511_v34 }
 0x1a1   : > { %v637_v19 = vadd.f32 %v636_v15, %v4509_v31  ;;  %v957_v20 = vadd.f32 %v956_v16, %v4509_v31  ;;  %v638_v21 = vpop.f32.mrb[43].mxu0  ;;  %v958_v0 = vpop.f32.mrb[43].mxu1 }
 0x1a2   : > { %v639_v24 = vadd.f32 %v638_v21, %v4511_v34  ;;  %v959_v25 = vadd.f32 %v958_v0, %v4511_v34 }
 0x1a3   : > { %v3189_v26 = vpack.c.bf16 %v637_v19, %v633_v17  ;;  %v3349_v27 = vpack.c.bf16 %v957_v20, %v953_v18 }
 0x1a4   : > { %v3509_v28 = vpack.c.bf16 %v639_v24, %v635_v22  ;;  %v3669_v29 = vpack.c.bf16 %v959_v25, %v955_v23 }
 0x1a5   : > { %3785 = vst [vmem:[%s4530_s28 + $0x50] sm:$0xff] %v3189_v26   ;;  %3817 = vst [vmem:[%s4530_s28 + $0x150] sm:$0xff] %v3349_v27  }
 0x1a6   : > { %3848 = vst [vmem:[%s4536_s29 + $0x50] sm:$0xff] %v3509_v28   ;;  %3880 = vst [vmem:[%s4536_s29 + $0x150] sm:$0xff] %v3669_v29   ;;  %v642_v30 = vpop.f32.mrb[44].mxu0  ;;  %v962_v32 = vpop.f32.mrb[44].mxu1 }
 0x1a7   : > { %v644_v33 = vpop.f32.mrb[45].mxu0  ;;  %v964_v35 = vpop.f32.mrb[45].mxu1  ;;  %v643_v38 = vadd.f32 %v642_v30, %v4509_v31  ;;  %v963_v39 = vadd.f32 %v962_v32, %v4509_v31 }
 0x1a8   : > { %v646_v36 = vpop.f32.mrb[46].mxu0  ;;  %v966_v37 = vpop.f32.mrb[46].mxu1  ;;  %v645_v44 = vadd.f32 %v644_v33, %v4511_v34  ;;  %v965_v45 = vadd.f32 %v964_v35, %v4511_v34 }
 0x1a9   : > { %v647_v40 = vadd.f32 %v646_v36, %v4509_v31  ;;  %v967_v41 = vadd.f32 %v966_v37, %v4509_v31  ;;  %v648_v42 = vpop.f32.mrb[47].mxu0  ;;  %v968_v43 = vpop.f32.mrb[47].mxu1 }
 0x1aa   : > { %v649_v46 = vadd.f32 %v648_v42, %v4511_v34  ;;  %v969_v47 = vadd.f32 %v968_v43, %v4511_v34 }
 0x1ab   : > { %v3194_v48 = vpack.c.bf16 %v647_v40, %v643_v38  ;;  %v3354_v49 = vpack.c.bf16 %v967_v41, %v963_v39 }
 0x1ac   : > { %v3514_v50 = vpack.c.bf16 %v649_v46, %v645_v44  ;;  %v3674_v51 = vpack.c.bf16 %v969_v47, %v965_v45 }
 0x1ad   : > { %3786 = vst [vmem:[%s4530_s28 + $0x58] sm:$0xff] %v3194_v48   ;;  %3818 = vst [vmem:[%s4530_s28 + $0x158] sm:$0xff] %v3354_v49  }
 0x1ae   : > { %3849 = vst [vmem:[%s4536_s29 + $0x58] sm:$0xff] %v3514_v50   ;;  %3881 = vst [vmem:[%s4536_s29 + $0x158] sm:$0xff] %v3674_v51   ;;  %v652_v52 = vpop.f32.mrb[48].mxu0  ;;  %v972_v53 = vpop.f32.mrb[48].mxu1 }
 0x1af   : > { %v654_v54 = vpop.f32.mrb[49].mxu0  ;;  %v974_v55 = vpop.f32.mrb[49].mxu1  ;;  %v653_v58 = vadd.f32 %v652_v52, %v4509_v31  ;;  %v973_v59 = vadd.f32 %v972_v53, %v4509_v31 }
 0x1b0   : > { %v656_v56 = vpop.f32.mrb[50].mxu0  ;;  %v976_v57 = vpop.f32.mrb[50].mxu1  ;;  %v655_v1 = vadd.f32 %v654_v54, %v4511_v34  ;;  %v975_v2 = vadd.f32 %v974_v55, %v4511_v34 }
 0x1b1   : > { %v657_v60 = vadd.f32 %v656_v56, %v4509_v31  ;;  %v977_v61 = vadd.f32 %v976_v57, %v4509_v31  ;;  %v658_v62 = vpop.f32.mrb[51].mxu0  ;;  %v978_v63 = vpop.f32.mrb[51].mxu1 }
 0x1b2   : > { %v659_v3 = vadd.f32 %v658_v62, %v4511_v34  ;;  %v979_v4 = vadd.f32 %v978_v63, %v4511_v34 }
 0x1b3   : > { %v3199_v5 = vpack.c.bf16 %v657_v60, %v653_v58  ;;  %v3359_v6 = vpack.c.bf16 %v977_v61, %v973_v59 }
 0x1b4   : > { %v3519_v7 = vpack.c.bf16 %v659_v3, %v655_v1  ;;  %v3679_v8 = vpack.c.bf16 %v979_v4, %v975_v2 }
 0x1b5   : > { %3787 = vst [vmem:[%s4530_s28 + $0x60] sm:$0xff] %v3199_v5   ;;  %3819 = vst [vmem:[%s4530_s28 + $0x160] sm:$0xff] %v3359_v6  }
 0x1b6   : > { %3850 = vst [vmem:[%s4536_s29 + $0x60] sm:$0xff] %v3519_v7   ;;  %3882 = vst [vmem:[%s4536_s29 + $0x160] sm:$0xff] %v3679_v8   ;;  %v662_v9 = vpop.f32.mrb[52].mxu0  ;;  %v982_v10 = vpop.f32.mrb[52].mxu1 }
 0x1b7   : > { %v664_v11 = vpop.f32.mrb[53].mxu0  ;;  %v984_v12 = vpop.f32.mrb[53].mxu1  ;;  %v663_v15 = vadd.f32 %v662_v9, %v4509_v31  ;;  %v983_v16 = vadd.f32 %v982_v10, %v4509_v31 }
 0x1b8   : > { %v666_v13 = vpop.f32.mrb[54].mxu0  ;;  %v986_v14 = vpop.f32.mrb[54].mxu1  ;;  %v665_v21 = vadd.f32 %v664_v11, %v4511_v34  ;;  %v985_v0 = vadd.f32 %v984_v12, %v4511_v34 }
 0x1b9   : > { %v667_v17 = vadd.f32 %v666_v13, %v4509_v31  ;;  %v987_v18 = vadd.f32 %v986_v14, %v4509_v31  ;;  %v668_v19 = vpop.f32.mrb[55].mxu0  ;;  %v988_v20 = vpop.f32.mrb[55].mxu1 }
 0x1ba   : > { %v669_v22 = vadd.f32 %v668_v19, %v4511_v34  ;;  %v989_v23 = vadd.f32 %v988_v20, %v4511_v34 }
 0x1bb   : > { %v3204_v24 = vpack.c.bf16 %v667_v17, %v663_v15  ;;  %v3364_v25 = vpack.c.bf16 %v987_v18, %v983_v16 }
 0x1bc   : > { %v3524_v26 = vpack.c.bf16 %v669_v22, %v665_v21  ;;  %v3684_v27 = vpack.c.bf16 %v989_v23, %v985_v0 }
 0x1bd   : > { %3788 = vst [vmem:[%s4530_s28 + $0x68] sm:$0xff] %v3204_v24   ;;  %3820 = vst [vmem:[%s4530_s28 + $0x168] sm:$0xff] %v3364_v25  }
 0x1be   : > { %3851 = vst [vmem:[%s4536_s29 + $0x68] sm:$0xff] %v3524_v26   ;;  %3883 = vst [vmem:[%s4536_s29 + $0x168] sm:$0xff] %v3684_v27   ;;  %v672_v28 = vpop.f32.mrb[56].mxu0  ;;  %v992_v29 = vpop.f32.mrb[56].mxu1 }
 0x1bf   : > { %v674_v30 = vpop.f32.mrb[57].mxu0  ;;  %v994_v32 = vpop.f32.mrb[57].mxu1  ;;  %v673_v36 = vadd.f32 %v672_v28, %v4509_v31  ;;  %v993_v37 = vadd.f32 %v992_v29, %v4509_v31 }
 0x1c0   : > { %v676_v33 = vpop.f32.mrb[58].mxu0  ;;  %v996_v35 = vpop.f32.mrb[58].mxu1  ;;  %v675_v42 = vadd.f32 %v674_v30, %v4511_v34  ;;  %v995_v43 = vadd.f32 %v994_v32, %v4511_v34 }
 0x1c1   : > { %v677_v38 = vadd.f32 %v676_v33, %v4509_v31  ;;  %v997_v39 = vadd.f32 %v996_v35, %v4509_v31  ;;  %v678_v40 = vpop.f32.mrb[59].mxu0  ;;  %v998_v41 = vpop.f32.mrb[59].mxu1 }
 0x1c2   : > { %v679_v44 = vadd.f32 %v678_v40, %v4511_v34  ;;  %v999_v45 = vadd.f32 %v998_v41, %v4511_v34 }
 0x1c3   : > { %v3209_v46 = vpack.c.bf16 %v677_v38, %v673_v36  ;;  %v3369_v47 = vpack.c.bf16 %v997_v39, %v993_v37 }
 0x1c4   : > { %v3529_v48 = vpack.c.bf16 %v679_v44, %v675_v42  ;;  %v3689_v49 = vpack.c.bf16 %v999_v45, %v995_v43 }
 0x1c5   : > { %3789 = vst [vmem:[%s4530_s28 + $0x70] sm:$0xff] %v3209_v46   ;;  %3821 = vst [vmem:[%s4530_s28 + $0x170] sm:$0xff] %v3369_v47  }
 0x1c6   : > { %3852 = vst [vmem:[%s4536_s29 + $0x70] sm:$0xff] %v3529_v48   ;;  %3884 = vst [vmem:[%s4536_s29 + $0x170] sm:$0xff] %v3689_v49   ;;  %v682_v50 = vpop.f32.mrb[60].mxu0  ;;  %v1002_v51 = vpop.f32.mrb[60].mxu1 }
 0x1c7   : > { %v684_v52 = vpop.f32.mrb[61].mxu0  ;;  %v1004_v53 = vpop.f32.mrb[61].mxu1  ;;  %v683_v56 = vadd.f32 %v682_v50, %v4509_v31  ;;  %v1003_v57 = vadd.f32 %v1002_v51, %v4509_v31 }
 0x1c8   : > { %v686_v54 = vpop.f32.mrb[62].mxu0  ;;  %v1006_v55 = vpop.f32.mrb[62].mxu1  ;;  %v685_v62 = vadd.f32 %v684_v52, %v4511_v34  ;;  %v1005_v63 = vadd.f32 %v1004_v53, %v4511_v34 }
 0x1c9   : > { %v687_v58 = vadd.f32 %v686_v54, %v4509_v31  ;;  %v1007_v59 = vadd.f32 %v1006_v55, %v4509_v31  ;;  %v688_v60 = vpop.f32.mrb[63].mxu0  ;;  %v1008_v61 = vpop.f32.mrb[63].mxu1 }
 0x1ca   : > { %v689_v1 = vadd.f32 %v688_v60, %v4511_v34  ;;  %v1009_v2 = vadd.f32 %v1008_v61, %v4511_v34 }
 0x1cb   : > { %v3214_v3 = vpack.c.bf16 %v687_v58, %v683_v56  ;;  %v3374_v4 = vpack.c.bf16 %v1007_v59, %v1003_v57 }
 0x1cc   : > { %v3534_v5 = vpack.c.bf16 %v689_v1, %v685_v62  ;;  %v3694_v6 = vpack.c.bf16 %v1009_v2, %v1005_v63 }
 0x1cd   : > { %3790 = vst [vmem:[%s4530_s28 + $0x78] sm:$0xff] %v3214_v3   ;;  %3822 = vst [vmem:[%s4530_s28 + $0x178] sm:$0xff] %v3374_v4  }
 0x1ce   : > { %3853 = vst [vmem:[%s4536_s29 + $0x78] sm:$0xff] %v3534_v5   ;;  %3885 = vst [vmem:[%s4536_s29 + $0x178] sm:$0xff] %v3694_v6   ;;  %v692_v7 = vpop.f32.mrb[64].mxu0  ;;  %v1012_v8 = vpop.f32.mrb[64].mxu1 }
 0x1cf   : > { %v694_v9 = vpop.f32.mrb[65].mxu0  ;;  %v1014_v10 = vpop.f32.mrb[65].mxu1  ;;  %v693_v13 = vadd.f32 %v692_v7, %v4509_v31  ;;  %v1013_v14 = vadd.f32 %v1012_v8, %v4509_v31 }
 0x1d0   : > { %v696_v11 = vpop.f32.mrb[66].mxu0  ;;  %v1016_v12 = vpop.f32.mrb[66].mxu1  ;;  %v695_v19 = vadd.f32 %v694_v9, %v4511_v34  ;;  %v1015_v20 = vadd.f32 %v1014_v10, %v4511_v34 }
 0x1d1   : > { %v697_v15 = vadd.f32 %v696_v11, %v4509_v31  ;;  %v1017_v16 = vadd.f32 %v1016_v12, %v4509_v31  ;;  %v698_v17 = vpop.f32.mrb[67].mxu0  ;;  %v1018_v18 = vpop.f32.mrb[67].mxu1 }
 0x1d2   : > { %v699_v21 = vadd.f32 %v698_v17, %v4511_v34  ;;  %v1019_v0 = vadd.f32 %v1018_v18, %v4511_v34 }
 0x1d3   : > { %v3219_v22 = vpack.c.bf16 %v697_v15, %v693_v13  ;;  %v3379_v23 = vpack.c.bf16 %v1017_v16, %v1013_v14 }
 0x1d4   : > { %v3539_v24 = vpack.c.bf16 %v699_v21, %v695_v19  ;;  %v3699_v25 = vpack.c.bf16 %v1019_v0, %v1015_v20 }
 0x1d5   : > { %3791 = vst [vmem:[%s4530_s28 + $0x80] sm:$0xff] %v3219_v22   ;;  %3823 = vst [vmem:[%s4530_s28 + $0x180] sm:$0xff] %v3379_v23  }
 0x1d6   : > { %3854 = vst [vmem:[%s4536_s29 + $0x80] sm:$0xff] %v3539_v24   ;;  %3886 = vst [vmem:[%s4536_s29 + $0x180] sm:$0xff] %v3699_v25   ;;  %v702_v26 = vpop.f32.mrb[68].mxu0  ;;  %v1022_v27 = vpop.f32.mrb[68].mxu1 }
 0x1d7   : > { %v704_v28 = vpop.f32.mrb[69].mxu0  ;;  %v1024_v29 = vpop.f32.mrb[69].mxu1  ;;  %v703_v33 = vadd.f32 %v702_v26, %v4509_v31  ;;  %v1023_v35 = vadd.f32 %v1022_v27, %v4509_v31 }
 0x1d8   : > { %v706_v30 = vpop.f32.mrb[70].mxu0  ;;  %v1026_v32 = vpop.f32.mrb[70].mxu1  ;;  %v705_v40 = vadd.f32 %v704_v28, %v4511_v34  ;;  %v1025_v41 = vadd.f32 %v1024_v29, %v4511_v34 }
 0x1d9   : > { %v707_v36 = vadd.f32 %v706_v30, %v4509_v31  ;;  %v1027_v37 = vadd.f32 %v1026_v32, %v4509_v31  ;;  %v708_v38 = vpop.f32.mrb[71].mxu0  ;;  %v1028_v39 = vpop.f32.mrb[71].mxu1 }
 0x1da   : > { %v709_v42 = vadd.f32 %v708_v38, %v4511_v34  ;;  %v1029_v43 = vadd.f32 %v1028_v39, %v4511_v34 }
 0x1db   : > { %v3224_v44 = vpack.c.bf16 %v707_v36, %v703_v33  ;;  %v3384_v45 = vpack.c.bf16 %v1027_v37, %v1023_v35 }
 0x1dc   : > { %v3544_v46 = vpack.c.bf16 %v709_v42, %v705_v40  ;;  %v3704_v47 = vpack.c.bf16 %v1029_v43, %v1025_v41 }
 0x1dd   : > { %3792 = vst [vmem:[%s4530_s28 + $0x88] sm:$0xff] %v3224_v44   ;;  %3824 = vst [vmem:[%s4530_s28 + $0x188] sm:$0xff] %v3384_v45  }
 0x1de   : > { %3855 = vst [vmem:[%s4536_s29 + $0x88] sm:$0xff] %v3544_v46   ;;  %3887 = vst [vmem:[%s4536_s29 + $0x188] sm:$0xff] %v3704_v47   ;;  %v712_v48 = vpop.f32.mrb[72].mxu0  ;;  %v1032_v49 = vpop.f32.mrb[72].mxu1 }
 0x1df   : > { %v714_v50 = vpop.f32.mrb[73].mxu0  ;;  %v1034_v51 = vpop.f32.mrb[73].mxu1  ;;  %v713_v54 = vadd.f32 %v712_v48, %v4509_v31  ;;  %v1033_v55 = vadd.f32 %v1032_v49, %v4509_v31 }
 0x1e0   : > { %v716_v52 = vpop.f32.mrb[74].mxu0  ;;  %v1036_v53 = vpop.f32.mrb[74].mxu1  ;;  %v715_v60 = vadd.f32 %v714_v50, %v4511_v34  ;;  %v1035_v61 = vadd.f32 %v1034_v51, %v4511_v34 }
 0x1e1   : > { %v717_v56 = vadd.f32 %v716_v52, %v4509_v31  ;;  %v1037_v57 = vadd.f32 %v1036_v53, %v4509_v31  ;;  %v718_v58 = vpop.f32.mrb[75].mxu0  ;;  %v1038_v59 = vpop.f32.mrb[75].mxu1 }
 0x1e2   : > { %v719_v62 = vadd.f32 %v718_v58, %v4511_v34  ;;  %v1039_v63 = vadd.f32 %v1038_v59, %v4511_v34 }
 0x1e3   : > { %v3229_v1 = vpack.c.bf16 %v717_v56, %v713_v54  ;;  %v3389_v2 = vpack.c.bf16 %v1037_v57, %v1033_v55 }
 0x1e4   : > { %v3549_v3 = vpack.c.bf16 %v719_v62, %v715_v60  ;;  %v3709_v4 = vpack.c.bf16 %v1039_v63, %v1035_v61 }
 0x1e5   : > { %3793 = vst [vmem:[%s4530_s28 + $0x90] sm:$0xff] %v3229_v1   ;;  %3825 = vst [vmem:[%s4530_s28 + $0x190] sm:$0xff] %v3389_v2  }
 0x1e6   : > { %3856 = vst [vmem:[%s4536_s29 + $0x90] sm:$0xff] %v3549_v3   ;;  %3888 = vst [vmem:[%s4536_s29 + $0x190] sm:$0xff] %v3709_v4   ;;  %v722_v5 = vpop.f32.mrb[76].mxu0  ;;  %v1042_v6 = vpop.f32.mrb[76].mxu1 }
 0x1e7   : > { %v724_v7 = vpop.f32.mrb[77].mxu0  ;;  %v1044_v8 = vpop.f32.mrb[77].mxu1  ;;  %v723_v11 = vadd.f32 %v722_v5, %v4509_v31  ;;  %v1043_v12 = vadd.f32 %v1042_v6, %v4509_v31 }
 0x1e8   : > { %v726_v9 = vpop.f32.mrb[78].mxu0  ;;  %v1046_v10 = vpop.f32.mrb[78].mxu1  ;;  %v725_v17 = vadd.f32 %v724_v7, %v4511_v34  ;;  %v1045_v18 = vadd.f32 %v1044_v8, %v4511_v34 }
 0x1e9   : > { %v727_v13 = vadd.f32 %v726_v9, %v4509_v31  ;;  %v1047_v14 = vadd.f32 %v1046_v10, %v4509_v31  ;;  %v728_v15 = vpop.f32.mrb[79].mxu0  ;;  %v1048_v16 = vpop.f32.mrb[79].mxu1 }
 0x1ea   : > { %v729_v19 = vadd.f32 %v728_v15, %v4511_v34  ;;  %v1049_v20 = vadd.f32 %v1048_v16, %v4511_v34 }
 0x1eb   : > { %v3234_v21 = vpack.c.bf16 %v727_v13, %v723_v11  ;;  %v3394_v0 = vpack.c.bf16 %v1047_v14, %v1043_v12 }
 0x1ec   : > { %v3554_v22 = vpack.c.bf16 %v729_v19, %v725_v17  ;;  %v3714_v23 = vpack.c.bf16 %v1049_v20, %v1045_v18 }
 0x1ed   : > { %3794 = vst [vmem:[%s4530_s28 + $0x98] sm:$0xff] %v3234_v21   ;;  %3826 = vst [vmem:[%s4530_s28 + $0x198] sm:$0xff] %v3394_v0  }
 0x1ee   : > { %3857 = vst [vmem:[%s4536_s29 + $0x98] sm:$0xff] %v3554_v22   ;;  %3889 = vst [vmem:[%s4536_s29 + $0x198] sm:$0xff] %v3714_v23   ;;  %v732_v24 = vpop.f32.mrb[80].mxu0  ;;  %v1052_v25 = vpop.f32.mrb[80].mxu1 }
 0x1ef   : > { %v734_v26 = vpop.f32.mrb[81].mxu0  ;;  %v1054_v27 = vpop.f32.mrb[81].mxu1  ;;  %v733_v30 = vadd.f32 %v732_v24, %v4509_v31  ;;  %v1053_v32 = vadd.f32 %v1052_v25, %v4509_v31 }
 0x1f0   : > { %v736_v28 = vpop.f32.mrb[82].mxu0  ;;  %v1056_v29 = vpop.f32.mrb[82].mxu1  ;;  %v735_v38 = vadd.f32 %v734_v26, %v4511_v34  ;;  %v1055_v39 = vadd.f32 %v1054_v27, %v4511_v34 }
 0x1f1   : > { %v737_v33 = vadd.f32 %v736_v28, %v4509_v31  ;;  %v1057_v35 = vadd.f32 %v1056_v29, %v4509_v31  ;;  %v738_v36 = vpop.f32.mrb[83].mxu0  ;;  %v1058_v37 = vpop.f32.mrb[83].mxu1 }
 0x1f2   : > { %v739_v40 = vadd.f32 %v738_v36, %v4511_v34  ;;  %v1059_v41 = vadd.f32 %v1058_v37, %v4511_v34 }
 0x1f3   : > { %v3239_v42 = vpack.c.bf16 %v737_v33, %v733_v30  ;;  %v3399_v43 = vpack.c.bf16 %v1057_v35, %v1053_v32 }
 0x1f4   : > { %v3559_v44 = vpack.c.bf16 %v739_v40, %v735_v38  ;;  %v3719_v45 = vpack.c.bf16 %v1059_v41, %v1055_v39 }
 0x1f5   : > { %3795 = vst [vmem:[%s4530_s28 + $0xa0] sm:$0xff] %v3239_v42   ;;  %3827 = vst [vmem:[%s4530_s28 + $0x1a0] sm:$0xff] %v3399_v43  }
 0x1f6   : > { %3858 = vst [vmem:[%s4536_s29 + $0xa0] sm:$0xff] %v3559_v44   ;;  %3890 = vst [vmem:[%s4536_s29 + $0x1a0] sm:$0xff] %v3719_v45   ;;  %v742_v46 = vpop.f32.mrb[84].mxu0  ;;  %v1062_v47 = vpop.f32.mrb[84].mxu1 }
 0x1f7   : > { %v744_v48 = vpop.f32.mrb[85].mxu0  ;;  %v1064_v49 = vpop.f32.mrb[85].mxu1  ;;  %v743_v52 = vadd.f32 %v742_v46, %v4509_v31  ;;  %v1063_v53 = vadd.f32 %v1062_v47, %v4509_v31 }
 0x1f8   : > { %v746_v50 = vpop.f32.mrb[86].mxu0  ;;  %v1066_v51 = vpop.f32.mrb[86].mxu1  ;;  %v745_v58 = vadd.f32 %v744_v48, %v4511_v34  ;;  %v1065_v59 = vadd.f32 %v1064_v49, %v4511_v34 }
 0x1f9   : > { %v747_v54 = vadd.f32 %v746_v50, %v4509_v31  ;;  %v1067_v55 = vadd.f32 %v1066_v51, %v4509_v31  ;;  %v748_v56 = vpop.f32.mrb[87].mxu0  ;;  %v1068_v57 = vpop.f32.mrb[87].mxu1 }
 0x1fa   : > { %v749_v60 = vadd.f32 %v748_v56, %v4511_v34  ;;  %v1069_v61 = vadd.f32 %v1068_v57, %v4511_v34 }
 0x1fb   : > { %v3244_v62 = vpack.c.bf16 %v747_v54, %v743_v52  ;;  %v3404_v63 = vpack.c.bf16 %v1067_v55, %v1063_v53 }
 0x1fc   : > { %v3564_v1 = vpack.c.bf16 %v749_v60, %v745_v58  ;;  %v3724_v2 = vpack.c.bf16 %v1069_v61, %v1065_v59 }
 0x1fd   : > { %3796 = vst [vmem:[%s4530_s28 + $0xa8] sm:$0xff] %v3244_v62   ;;  %3828 = vst [vmem:[%s4530_s28 + $0x1a8] sm:$0xff] %v3404_v63  }
 0x1fe   : > { %3859 = vst [vmem:[%s4536_s29 + $0xa8] sm:$0xff] %v3564_v1   ;;  %3891 = vst [vmem:[%s4536_s29 + $0x1a8] sm:$0xff] %v3724_v2   ;;  %v752_v3 = vpop.f32.mrb[88].mxu0  ;;  %v1072_v4 = vpop.f32.mrb[88].mxu1 }
 0x1ff   : > { %v754_v5 = vpop.f32.mrb[89].mxu0  ;;  %v1074_v6 = vpop.f32.mrb[89].mxu1  ;;  %v753_v9 = vadd.f32 %v752_v3, %v4509_v31  ;;  %v1073_v10 = vadd.f32 %v1072_v4, %v4509_v31 }
 0x200   : > { %v756_v7 = vpop.f32.mrb[90].mxu0  ;;  %v1076_v8 = vpop.f32.mrb[90].mxu1  ;;  %v755_v15 = vadd.f32 %v754_v5, %v4511_v34  ;;  %v1075_v16 = vadd.f32 %v1074_v6, %v4511_v34 }
 0x201   : > { %v757_v11 = vadd.f32 %v756_v7, %v4509_v31  ;;  %v1077_v12 = vadd.f32 %v1076_v8, %v4509_v31  ;;  %v758_v13 = vpop.f32.mrb[91].mxu0  ;;  %v1078_v14 = vpop.f32.mrb[91].mxu1 }
 0x202   : > { %v759_v17 = vadd.f32 %v758_v13, %v4511_v34  ;;  %v1079_v18 = vadd.f32 %v1078_v14, %v4511_v34 }
 0x203   : > { %v3249_v19 = vpack.c.bf16 %v757_v11, %v753_v9  ;;  %v3409_v20 = vpack.c.bf16 %v1077_v12, %v1073_v10 }
 0x204   : > { %v3569_v21 = vpack.c.bf16 %v759_v17, %v755_v15  ;;  %v3729_v0 = vpack.c.bf16 %v1079_v18, %v1075_v16 }
 0x205   : > { %3797 = vst [vmem:[%s4530_s28 + $0xb0] sm:$0xff] %v3249_v19   ;;  %3829 = vst [vmem:[%s4530_s28 + $0x1b0] sm:$0xff] %v3409_v20  }
 0x206   : > { %3860 = vst [vmem:[%s4536_s29 + $0xb0] sm:$0xff] %v3569_v21   ;;  %3892 = vst [vmem:[%s4536_s29 + $0x1b0] sm:$0xff] %v3729_v0   ;;  %v762_v22 = vpop.f32.mrb[92].mxu0  ;;  %v1082_v23 = vpop.f32.mrb[92].mxu1 }
 0x207   : > { %v764_v24 = vpop.f32.mrb[93].mxu0  ;;  %v1084_v25 = vpop.f32.mrb[93].mxu1  ;;  %v763_v28 = vadd.f32 %v762_v22, %v4509_v31  ;;  %v1083_v29 = vadd.f32 %v1082_v23, %v4509_v31 }
 0x208   : > { %v766_v26 = vpop.f32.mrb[94].mxu0  ;;  %v1086_v27 = vpop.f32.mrb[94].mxu1  ;;  %v765_v36 = vadd.f32 %v764_v24, %v4511_v34  ;;  %v1085_v37 = vadd.f32 %v1084_v25, %v4511_v34 }
 0x209   : > { %v767_v30 = vadd.f32 %v766_v26, %v4509_v31  ;;  %v1087_v32 = vadd.f32 %v1086_v27, %v4509_v31  ;;  %v768_v33 = vpop.f32.mrb[95].mxu0  ;;  %v1088_v35 = vpop.f32.mrb[95].mxu1 }
 0x20a   : > { %v769_v38 = vadd.f32 %v768_v33, %v4511_v34  ;;  %v1089_v39 = vadd.f32 %v1088_v35, %v4511_v34 }
 0x20b   : > { %v3254_v40 = vpack.c.bf16 %v767_v30, %v763_v28  ;;  %v3414_v41 = vpack.c.bf16 %v1087_v32, %v1083_v29 }
 0x20c   : > { %v3574_v42 = vpack.c.bf16 %v769_v38, %v765_v36  ;;  %v3734_v43 = vpack.c.bf16 %v1089_v39, %v1085_v37 }
 0x20d   : > { %3798 = vst [vmem:[%s4530_s28 + $0xb8] sm:$0xff] %v3254_v40   ;;  %3830 = vst [vmem:[%s4530_s28 + $0x1b8] sm:$0xff] %v3414_v41  }
 0x20e   : > { %3861 = vst [vmem:[%s4536_s29 + $0xb8] sm:$0xff] %v3574_v42   ;;  %3893 = vst [vmem:[%s4536_s29 + $0x1b8] sm:$0xff] %v3734_v43   ;;  %v772_v44 = vpop.f32.mrb[96].mxu0  ;;  %v1092_v45 = vpop.f32.mrb[96].mxu1 }
 0x20f   : > { %v774_v46 = vpop.f32.mrb[97].mxu0  ;;  %v1094_v47 = vpop.f32.mrb[97].mxu1  ;;  %v773_v50 = vadd.f32 %v772_v44, %v4509_v31  ;;  %v1093_v51 = vadd.f32 %v1092_v45, %v4509_v31 }
 0x210   : > { %v776_v48 = vpop.f32.mrb[98].mxu0  ;;  %v1096_v49 = vpop.f32.mrb[98].mxu1  ;;  %v775_v56 = vadd.f32 %v774_v46, %v4511_v34  ;;  %v1095_v57 = vadd.f32 %v1094_v47, %v4511_v34 }
 0x211   : > { %v777_v52 = vadd.f32 %v776_v48, %v4509_v31  ;;  %v1097_v53 = vadd.f32 %v1096_v49, %v4509_v31  ;;  %v778_v54 = vpop.f32.mrb[99].mxu0  ;;  %v1098_v55 = vpop.f32.mrb[99].mxu1 }
 0x212   : > { %v779_v58 = vadd.f32 %v778_v54, %v4511_v34  ;;  %v1099_v59 = vadd.f32 %v1098_v55, %v4511_v34 }
 0x213   : > { %v3259_v60 = vpack.c.bf16 %v777_v52, %v773_v50  ;;  %v3419_v61 = vpack.c.bf16 %v1097_v53, %v1093_v51 }
 0x214   : > { %v3579_v62 = vpack.c.bf16 %v779_v58, %v775_v56  ;;  %v3739_v63 = vpack.c.bf16 %v1099_v59, %v1095_v57 }
 0x215   : > { %3799 = vst [vmem:[%s4530_s28 + $0xc0] sm:$0xff] %v3259_v60   ;;  %3831 = vst [vmem:[%s4530_s28 + $0x1c0] sm:$0xff] %v3419_v61  }
 0x216   : > { %3862 = vst [vmem:[%s4536_s29 + $0xc0] sm:$0xff] %v3579_v62   ;;  %3894 = vst [vmem:[%s4536_s29 + $0x1c0] sm:$0xff] %v3739_v63   ;;  %v782_v1 = vpop.f32.mrb[100].mxu0  ;;  %v1102_v2 = vpop.f32.mrb[100].mxu1 }
 0x217   : > { %v784_v3 = vpop.f32.mrb[101].mxu0  ;;  %v1104_v4 = vpop.f32.mrb[101].mxu1  ;;  %v783_v7 = vadd.f32 %v782_v1, %v4509_v31  ;;  %v1103_v8 = vadd.f32 %v1102_v2, %v4509_v31 }
 0x218   : > { %v786_v5 = vpop.f32.mrb[102].mxu0  ;;  %v1106_v6 = vpop.f32.mrb[102].mxu1  ;;  %v785_v13 = vadd.f32 %v784_v3, %v4511_v34  ;;  %v1105_v14 = vadd.f32 %v1104_v4, %v4511_v34 }
 0x219   : > { %v787_v9 = vadd.f32 %v786_v5, %v4509_v31  ;;  %v1107_v10 = vadd.f32 %v1106_v6, %v4509_v31  ;;  %v788_v11 = vpop.f32.mrb[103].mxu0  ;;  %v1108_v12 = vpop.f32.mrb[103].mxu1 }
 0x21a   : > { %v789_v15 = vadd.f32 %v788_v11, %v4511_v34  ;;  %v1109_v16 = vadd.f32 %v1108_v12, %v4511_v34 }
 0x21b   : > { %v3264_v17 = vpack.c.bf16 %v787_v9, %v783_v7  ;;  %v3424_v18 = vpack.c.bf16 %v1107_v10, %v1103_v8 }
 0x21c   : > { %v3584_v19 = vpack.c.bf16 %v789_v15, %v785_v13  ;;  %v3744_v20 = vpack.c.bf16 %v1109_v16, %v1105_v14 }
 0x21d   : > { %3800 = vst [vmem:[%s4530_s28 + $0xc8] sm:$0xff] %v3264_v17   ;;  %3832 = vst [vmem:[%s4530_s28 + $0x1c8] sm:$0xff] %v3424_v18  }
 0x21e   : > { %3863 = vst [vmem:[%s4536_s29 + $0xc8] sm:$0xff] %v3584_v19   ;;  %3895 = vst [vmem:[%s4536_s29 + $0x1c8] sm:$0xff] %v3744_v20   ;;  %v792_v21 = vpop.f32.mrb[104].mxu0  ;;  %v1112_v0 = vpop.f32.mrb[104].mxu1 }
 0x21f   : > { %v794_v22 = vpop.f32.mrb[105].mxu0  ;;  %v1114_v23 = vpop.f32.mrb[105].mxu1  ;;  %v793_v26 = vadd.f32 %v792_v21, %v4509_v31  ;;  %v1113_v27 = vadd.f32 %v1112_v0, %v4509_v31 }
 0x220   : > { %v796_v24 = vpop.f32.mrb[106].mxu0  ;;  %v1116_v25 = vpop.f32.mrb[106].mxu1  ;;  %v795_v33 = vadd.f32 %v794_v22, %v4511_v34  ;;  %v1115_v35 = vadd.f32 %v1114_v23, %v4511_v34 }
 0x221   : > { %v797_v28 = vadd.f32 %v796_v24, %v4509_v31  ;;  %v1117_v29 = vadd.f32 %v1116_v25, %v4509_v31  ;;  %v798_v30 = vpop.f32.mrb[107].mxu0  ;;  %v1118_v32 = vpop.f32.mrb[107].mxu1 }
 0x222   : > { %v799_v36 = vadd.f32 %v798_v30, %v4511_v34  ;;  %v1119_v37 = vadd.f32 %v1118_v32, %v4511_v34 }
 0x223   : > { %v3269_v38 = vpack.c.bf16 %v797_v28, %v793_v26  ;;  %v3429_v39 = vpack.c.bf16 %v1117_v29, %v1113_v27 }
 0x224   : > { %v3589_v40 = vpack.c.bf16 %v799_v36, %v795_v33  ;;  %v3749_v41 = vpack.c.bf16 %v1119_v37, %v1115_v35 }
 0x225   : > { %3801 = vst [vmem:[%s4530_s28 + $0xd0] sm:$0xff] %v3269_v38   ;;  %3833 = vst [vmem:[%s4530_s28 + $0x1d0] sm:$0xff] %v3429_v39  }
 0x226   : > { %3864 = vst [vmem:[%s4536_s29 + $0xd0] sm:$0xff] %v3589_v40   ;;  %3896 = vst [vmem:[%s4536_s29 + $0x1d0] sm:$0xff] %v3749_v41   ;;  %v802_v42 = vpop.f32.mrb[108].mxu0  ;;  %v1122_v43 = vpop.f32.mrb[108].mxu1 }
 0x227   : > { %v804_v44 = vpop.f32.mrb[109].mxu0  ;;  %v1124_v45 = vpop.f32.mrb[109].mxu1  ;;  %v803_v48 = vadd.f32 %v802_v42, %v4509_v31  ;;  %v1123_v49 = vadd.f32 %v1122_v43, %v4509_v31 }
 0x228   : > { %v806_v46 = vpop.f32.mrb[110].mxu0  ;;  %v1126_v47 = vpop.f32.mrb[110].mxu1  ;;  %v805_v54 = vadd.f32 %v804_v44, %v4511_v34  ;;  %v1125_v55 = vadd.f32 %v1124_v45, %v4511_v34 }
 0x229   : > { %v807_v50 = vadd.f32 %v806_v46, %v4509_v31  ;;  %v1127_v51 = vadd.f32 %v1126_v47, %v4509_v31  ;;  %v808_v52 = vpop.f32.mrb[111].mxu0  ;;  %v1128_v53 = vpop.f32.mrb[111].mxu1 }
 0x22a   : > { %v809_v56 = vadd.f32 %v808_v52, %v4511_v34  ;;  %v1129_v57 = vadd.f32 %v1128_v53, %v4511_v34 }
 0x22b   : > { %v3274_v58 = vpack.c.bf16 %v807_v50, %v803_v48  ;;  %v3434_v59 = vpack.c.bf16 %v1127_v51, %v1123_v49 }
 0x22c   : > { %v3594_v60 = vpack.c.bf16 %v809_v56, %v805_v54  ;;  %v3754_v61 = vpack.c.bf16 %v1129_v57, %v1125_v55 }
 0x22d   : > { %3802 = vst [vmem:[%s4530_s28 + $0xd8] sm:$0xff] %v3274_v58   ;;  %3834 = vst [vmem:[%s4530_s28 + $0x1d8] sm:$0xff] %v3434_v59  }
 0x22e   : > { %3865 = vst [vmem:[%s4536_s29 + $0xd8] sm:$0xff] %v3594_v60   ;;  %3897 = vst [vmem:[%s4536_s29 + $0x1d8] sm:$0xff] %v3754_v61   ;;  %v812_v62 = vpop.f32.mrb[112].mxu0  ;;  %v1132_v63 = vpop.f32.mrb[112].mxu1 }
 0x22f   : > { %v814_v1 = vpop.f32.mrb[113].mxu0  ;;  %v1134_v2 = vpop.f32.mrb[113].mxu1  ;;  %v813_v5 = vadd.f32 %v812_v62, %v4509_v31  ;;  %v1133_v6 = vadd.f32 %v1132_v63, %v4509_v31 }
 0x230   : > { %v816_v3 = vpop.f32.mrb[114].mxu0  ;;  %v1136_v4 = vpop.f32.mrb[114].mxu1  ;;  %v815_v11 = vadd.f32 %v814_v1, %v4511_v34  ;;  %v1135_v12 = vadd.f32 %v1134_v2, %v4511_v34 }
 0x231   : > { %v817_v7 = vadd.f32 %v816_v3, %v4509_v31  ;;  %v1137_v8 = vadd.f32 %v1136_v4, %v4509_v31  ;;  %v818_v9 = vpop.f32.mrb[115].mxu0  ;;  %v1138_v10 = vpop.f32.mrb[115].mxu1 }
 0x232   : > { %v819_v13 = vadd.f32 %v818_v9, %v4511_v34  ;;  %v1139_v14 = vadd.f32 %v1138_v10, %v4511_v34 }
 0x233   : > { %v3279_v15 = vpack.c.bf16 %v817_v7, %v813_v5  ;;  %v3439_v16 = vpack.c.bf16 %v1137_v8, %v1133_v6 }
 0x234   : > { %v3599_v17 = vpack.c.bf16 %v819_v13, %v815_v11  ;;  %v3759_v18 = vpack.c.bf16 %v1139_v14, %v1135_v12 }
 0x235   : > { %3803 = vst [vmem:[%s4530_s28 + $0xe0] sm:$0xff] %v3279_v15   ;;  %3835 = vst [vmem:[%s4530_s28 + $0x1e0] sm:$0xff] %v3439_v16  }
 0x236   : > { %3866 = vst [vmem:[%s4536_s29 + $0xe0] sm:$0xff] %v3599_v17   ;;  %3898 = vst [vmem:[%s4536_s29 + $0x1e0] sm:$0xff] %v3759_v18   ;;  %v822_v19 = vpop.f32.mrb[116].mxu0  ;;  %v1142_v20 = vpop.f32.mrb[116].mxu1 }
 0x237   : > { %v824_v21 = vpop.f32.mrb[117].mxu0  ;;  %v1144_v0 = vpop.f32.mrb[117].mxu1  ;;  %v823_v24 = vadd.f32 %v822_v19, %v4509_v31  ;;  %v1143_v25 = vadd.f32 %v1142_v20, %v4509_v31 }
 0x238   : > { %v826_v22 = vpop.f32.mrb[118].mxu0  ;;  %v1146_v23 = vpop.f32.mrb[118].mxu1  ;;  %v825_v30 = vadd.f32 %v824_v21, %v4511_v34  ;;  %v1145_v32 = vadd.f32 %v1144_v0, %v4511_v34 }
 0x239   : > { %v827_v26 = vadd.f32 %v826_v22, %v4509_v31  ;;  %v1147_v27 = vadd.f32 %v1146_v23, %v4509_v31  ;;  %v828_v28 = vpop.f32.mrb[119].mxu0  ;;  %v1148_v29 = vpop.f32.mrb[119].mxu1 }
 0x23a   : > { %v829_v33 = vadd.f32 %v828_v28, %v4511_v34  ;;  %v1149_v35 = vadd.f32 %v1148_v29, %v4511_v34 }
 0x23b   : > { %v3284_v36 = vpack.c.bf16 %v827_v26, %v823_v24  ;;  %v3444_v37 = vpack.c.bf16 %v1147_v27, %v1143_v25 }
 0x23c   : > { %v3604_v38 = vpack.c.bf16 %v829_v33, %v825_v30  ;;  %v3764_v39 = vpack.c.bf16 %v1149_v35, %v1145_v32 }
 0x23d   : > { %3804 = vst [vmem:[%s4530_s28 + $0xe8] sm:$0xff] %v3284_v36   ;;  %3836 = vst [vmem:[%s4530_s28 + $0x1e8] sm:$0xff] %v3444_v37  }
 0x23e   : > { %3867 = vst [vmem:[%s4536_s29 + $0xe8] sm:$0xff] %v3604_v38   ;;  %3899 = vst [vmem:[%s4536_s29 + $0x1e8] sm:$0xff] %v3764_v39   ;;  %v832_v40 = vpop.f32.mrb[120].mxu0  ;;  %v1152_v41 = vpop.f32.mrb[120].mxu1 }
 0x23f   : > { %v834_v42 = vpop.f32.mrb[121].mxu0  ;;  %v1154_v43 = vpop.f32.mrb[121].mxu1  ;;  %v833_v46 = vadd.f32 %v832_v40, %v4509_v31  ;;  %v1153_v47 = vadd.f32 %v1152_v41, %v4509_v31 }
 0x240   : > { %v836_v44 = vpop.f32.mrb[122].mxu0  ;;  %v1156_v45 = vpop.f32.mrb[122].mxu1  ;;  %v835_v52 = vadd.f32 %v834_v42, %v4511_v34  ;;  %v1155_v53 = vadd.f32 %v1154_v43, %v4511_v34 }
 0x241   : > { %v837_v48 = vadd.f32 %v836_v44, %v4509_v31  ;;  %v1157_v49 = vadd.f32 %v1156_v45, %v4509_v31  ;;  %v838_v50 = vpop.f32.mrb[123].mxu0  ;;  %v1158_v51 = vpop.f32.mrb[123].mxu1 }
 0x242   : > { %v839_v54 = vadd.f32 %v838_v50, %v4511_v34  ;;  %v1159_v55 = vadd.f32 %v1158_v51, %v4511_v34 }
 0x243   : > { %v3289_v56 = vpack.c.bf16 %v837_v48, %v833_v46  ;;  %v3449_v57 = vpack.c.bf16 %v1157_v49, %v1153_v47 }
 0x244   : > { %v3609_v58 = vpack.c.bf16 %v839_v54, %v835_v52  ;;  %v3769_v59 = vpack.c.bf16 %v1159_v55, %v1155_v53 }
 0x245   : > { %3805 = vst [vmem:[%s4530_s28 + $0xf0] sm:$0xff] %v3289_v56   ;;  %3837 = vst [vmem:[%s4530_s28 + $0x1f0] sm:$0xff] %v3449_v57  }
 0x246   : > { %3868 = vst [vmem:[%s4536_s29 + $0xf0] sm:$0xff] %v3609_v58   ;;  %3900 = vst [vmem:[%s4536_s29 + $0x1f0] sm:$0xff] %v3769_v59   ;;  %v842_v60 = vpop.f32.mrb[124].mxu0  ;;  %v1162_v61 = vpop.f32.mrb[124].mxu1 }
 0x247   : > { %v844_v62 = vpop.f32.mrb[125].mxu0  ;;  %v1164_v63 = vpop.f32.mrb[125].mxu1  ;;  %v843_v3 = vadd.f32 %v842_v60, %v4509_v31  ;;  %v1163_v4 = vadd.f32 %v1162_v61, %v4509_v31 }
 0x248   : > { %v846_v1 = vpop.f32.mrb[126].mxu0  ;;  %v1166_v2 = vpop.f32.mrb[126].mxu1  ;;  %v845_v9 = vadd.f32 %v844_v62, %v4511_v34  ;;  %v1165_v10 = vadd.f32 %v1164_v63, %v4511_v34 }
 0x249   : > { %v847_v5 = vadd.f32 %v846_v1, %v4509_v31  ;;  %v1167_v6 = vadd.f32 %v1166_v2, %v4509_v31  ;;  %v848_v7 = vpop.f32.mrb[127].mxu0  ;;  %v1168_v8 = vpop.f32.mrb[127].mxu1 }
 0x24a   : > { %v849_v11 = vadd.f32 %v848_v7, %v4511_v34  ;;  %v1169_v31 = vadd.f32 %v1168_v8, %v4511_v34 }
 0x24b   : > { %v3294_v12 = vpack.c.bf16 %v847_v5, %v843_v3  ;;  %v3454_v13 = vpack.c.bf16 %v1167_v6, %v1163_v4 }
 0x24c   : > { %v3614_v14 = vpack.c.bf16 %v849_v11, %v845_v9  ;;  %v3774_v15 = vpack.c.bf16 %v1169_v31, %v1165_v10 }
 0x24d   : > { %3806 = vst [vmem:[%s4530_s28 + $0xf8] sm:$0xff] %v3294_v12   ;;  %3838 = vst [vmem:[%s4530_s28 + $0x1f8] sm:$0xff] %v3454_v13  }
 0x24e   : > { %3869 = vst [vmem:[%s4536_s29 + $0xf8] sm:$0xff] %v3614_v14   ;;  %3901 = vst [vmem:[%s4536_s29 + $0x1f8] sm:$0xff] %v3774_v15  }
 0x24f   : > { %4058 = shalt.err (!%p4055_p7)
}
 0x250   : > { %s4059_s9 = scalar_lea.hbm %s4927_s19, 8192  ;;  %s4063_s10 = scalar_lea.hbm %s5022_s3, 16384 }
 0x251   : > { %p4060_p9 = scmp.ne.s32.totalorder %s4927_s19, %s4059_s9  ;;  %p4064_p5 = scmp.lt.u32.totalorder %s4927_s19, %s5022_s3 }
 0x252   : > { %p4065_p11 = scmp.lt.u32.totalorder %s4063_s10, %s4059_s9  ;;  %p4067_p4 = scmp.lt.u32.totalorder %s4059_s9, %s4927_s19 }
 0x253   : > { %p4061_p2 = pnand %p4060_p9, %p4276_p12 }
 0x254   : > { %p4066_p1 = por %p4065_p11, %p4064_p5 }
 0x255   : > { %p4062_p0 = pneg %p4061_p2 }
 0x256   : > { %p4068_p6 = por %p4067_p4, %p4066_p1 }
 0x258   : > { %p4069_p8 = pnand %p4068_p6, %p4062_p0 }
 0x25a   : > { %4072 = shalt.err (!%p4069_p8)
}
 0x25b   : > { %s4157_s8 = smov 64   ;;  %s4158_s25 = smov 4  }
 0x25c   : > { %3924 = dma.vmem_to_hbm [thread:$0]  (%p4276_p12), %s4934_s6, 8192, %s4927_s19, %s2452_s13, %s4157_s8, %s4157_s8, %s4158_s25  }
 0x25d   : > { %s2457_s14 = scalar_lea.sflag [#allocation9], %s4324_s12  ;;  %s4073_s20 = scalar_lea.vmem %s4941_s26, 8192 }
 0x25e   : > { %p4074_p10 = scmp.ne.s32.totalorder %s4941_s26, %s4073_s20  ;;  %s4159_s21 = smov [#allocation8]  }
 0x25f   : > { %s4077_s23 = sshll.u32 %s4159_s21, 4  ;;  %s4078_s23 = int_to_ptr.vmem [resolvable:$false] %s4077_s23 }
 0x260   : > { %p4075_p13 = pnand %p4074_p10, %p4276_p12  ;;  %s4079_s9 = scalar_lea.vmem %s4078_s23, 16384 }
 0x261   : > { %p4080_p7 = scmp.lt.s32.totalorder %s4941_s26, %s4078_s23  ;;  %p4081_p9 = scmp.lt.s32.totalorder %s4079_s9, %s4073_s20 }
 0x262   : > { %p4076_p3 = pneg %p4075_p13 }
 0x263   : > { %p4082_p2 = por %p4081_p9, %p4080_p7 }
 0x265   : > { %p4083_p0 = pnand %p4082_p2, %p4076_p3 }
 0x267   : > { %4086 = shalt.err (!%p4083_p0)
}
 0x268   : > { %s4087_s6 = scalar_lea.hbm %s4939_s11, 8192  ;;  %s4091_s28 = scalar_lea.hbm %s5023_s4, 16384 }
 0x269   : > { %p4088_p5 = scmp.ne.s32.totalorder %s4939_s11, %s4087_s6  ;;  %p4092_p4 = scmp.lt.u32.totalorder %s4939_s11, %s5023_s4 }
 0x26a   : > { %p4093_p6 = scmp.lt.u32.totalorder %s4091_s28, %s4087_s6  ;;  %p4095_p10 = scmp.lt.u32.totalorder %s4087_s6, %s4939_s11 }
 0x26b   : > { %p4089_p11 = pnand %p4088_p5, %p4276_p12 }
 0x26c   : > { %p4094_p8 = por %p4093_p6, %p4092_p4 }
 0x26d   : > { %p4090_p1 = pneg %p4089_p11 }
 0x26e   : > { %p4096_p13 = por %p4095_p10, %p4094_p8 }
 0x270   : > { %p4097_p3 = pnand %p4096_p13, %p4090_p1 }
 0x272   : > { %4100 = shalt.err (!%p4097_p3)
}
 0x273   : > { %3925 = dma.vmem_to_hbm [thread:$0]  (%p4276_p12), %s4941_s26, 8192, %s4939_s11, %s2457_s14, %s4157_s8, %s4157_s8, %s4158_s25  }
 0x274 PF: > { %s2501_s5 = sand.u32 1, %s4135_s15   ;;  %p5038_p7 = scmp.ne.s32.totalorder %s5028_s22, 0 }
 0x275   : > { %p5039_p9 = scmp.ge.s32.totalorder %s4147_s18, 2  ;;  %s2502_s7 = scalar_lea.sflag [#allocation4], %s2501_s5 }
 0x277   : > { %p3937_p2 = pnand %p5039_p9, %p5038_p7 }
 0x279   : > { %4126 = dma.done.wait (!%p3937_p2), %s2502_s7, 8192  }
 0x27a   : > { %4128 = vsyncadd (!%p3937_p2), %s2502_s7, 4294959104  ;;  %s2511_s30 = scalar_lea.sflag [#allocation9], %s2501_s5 }
 0x27b   : > { %4130 = dma.done.wait (!%p3937_p2), %s2511_s30, 8192  }
 0x27c   : > { %4132 = vsyncadd (!%p3937_p2), %s2511_s30, 4294959104  ;;  %p22_p12 = scmp.ge.s32.totalorder %s4241_s27, 4   ;;  %s5040_s15 = smov %s4139_s16 }
 0x27d   : > { %s5041_s16 = smov %s4143_s17  ;;  %s5042_s17 = smov %s4272_s24 }
 0x27e   : > { %s5043_s18 = smov %s4241_s27  ;;  %24 = sbr.rel (!%p22_p12) target bundleno = 8 (0x8), region = 98 }
 0x285   :  { %2516 = vsyncpa [#allocation3], 1 }
 0x286   :  { %2518 = vsyncpa [#allocation3 + $0x1], 1 }
 0x287   :  { %2519 = vsyncpa [#allocation6], 1 }
 0x288   :  { %2520 = vsyncpa [#allocation4], 1 }
 0x289   :  { %2522 = vsyncpa [#allocation4 + $0x1], 1 }
 0x28a   :  { %2523 = vsyncpa [#allocation9], 1 }
 0x28b   :  { %2525 = vsyncpa [#allocation9 + $0x1], 1 }

</bundles_post_ra>
